<compile_context>
chip_gen: v5e
topology: v5e:2x2
jax: 0.10.0
libtpu: 0.0.40
codegen_flags: <defaults>
</compile_context>

<pallas_src>
import functools

import jax
import jax.numpy as jnp
from jax.experimental import pallas as pl
from jax.experimental.pallas import tpu as pltpu

LANE = 128                      # vreg lane width: pad feature dims to this
TILE_DST_MAX = 512              # dst-node tile (amortizes step overhead / hr re-reads)
TILE_SRC_MAX = 1024             # src / reduction tile (adj tile = DST x SRC bf16)
VMEM_LIMIT = 32 * 1024 * 1024   # explicit scoped-VMEM budget (safe on v5e/v6e/v7x)
# Tiny per-dst-tile epilogue matmuls keep f32 parity with the PyTorch reference;
# the dominant aggregation matmul uses the native single-pass bf16 MXU path.
EPILOGUE_PRECISION = jax.lax.Precision.HIGHEST


def _round_up(x, m):
    return ((x + m - 1) // m) * m


def _choose_tiles(n):
    """Pick (n_pad, tile_dst, tile_src) so both tiles divide n_pad."""
    n_pad = _round_up(n, 256)
    tile_src = min(TILE_SRC_MAX, n_pad)
    n_pad = _round_up(n_pad, tile_src)
    tile_dst = min(TILE_DST_MAX, n_pad)
    while n_pad % tile_dst:
        tile_dst //= 2
    return n_pad, tile_dst, tile_src


# ----------------------------- node encoder ---------------------------------

def node_encoder_kernel(x_ref, w_ref, b_ref, h_ref, hr_ref):
    h = jnp.dot(x_ref[...], w_ref[...],
                preferred_element_type=jnp.float32,
                precision=EPILOGUE_PRECISION) + b_ref[...]
    h_ref[...] = h
    # relu(h0) emitted once in bf16, consumed by layer 0's GIN aggregation.
    hr_ref[...] = jnp.maximum(h, 0.0).astype(jnp.bfloat16)


def node_encoder(x_p, w, b, tile_n):
    n_pad, in_dim = x_p.shape
    e_pad = w.shape[1]
    flops = 2 * n_pad * in_dim * e_pad
    bytes_accessed = (4 * (n_pad * in_dim + in_dim * e_pad + e_pad + n_pad * e_pad)
                      + 2 * n_pad * e_pad)
    return pl.pallas_call(
        node_encoder_kernel,
        out_shape=(jax.ShapeDtypeStruct((n_pad, e_pad), jnp.float32),
                   jax.ShapeDtypeStruct((n_pad, e_pad), jnp.bfloat16)),
        grid_spec=pltpu.PrefetchScalarGridSpec(
            num_scalar_prefetch=0,
            grid=(n_pad // tile_n,),
            in_specs=[
                pl.BlockSpec((tile_n, in_dim), lambda i: (i, 0)),
                pl.BlockSpec((in_dim, e_pad), lambda i: (0, 0)),
                pl.BlockSpec((1, e_pad), lambda i: (0, 0)),
            ],
            out_specs=[
                pl.BlockSpec((tile_n, e_pad), lambda i: (i, 0)),
                pl.BlockSpec((tile_n, e_pad), lambda i: (i, 0)),
            ],
        ),
        compiler_params=pltpu.CompilerParams(
            dimension_semantics=("parallel",),
            vmem_limit_bytes=VMEM_LIMIT),
        cost_estimate=pl.CostEstimate(flops=int(flops), transcendentals=0,
                                      bytes_accessed=int(bytes_accessed)),
    )(x_p, w, b)


# ------------------------------- GIN layer -----------------------------------

def gin_layer_kernel(selfscale_ref, h_ref, adj_ref, hr_ref,
                     w1_ref, b1_ref, w2_ref, b2_ref,
                     o_ref, or_ref, acc_ref, *, final_relu):
    k = pl.program_id(1)

    @pl.when(k == 0)
    def _():
        acc_ref[...] = jnp.zeros_like(acc_ref)

    # Partial add-aggregation of relu(h) over this src tile.
    # Single-pass bf16 x bf16 MXU matmul with f32 accumulation (native on
    # v5e/v6e/v7x); adj counts are exact in bf16 (< 256 parallel edges).
    acc_ref[...] += jnp.dot(adj_ref[...], hr_ref[...],
                            preferred_element_type=jnp.float32)

    @pl.when(k == pl.num_programs(1) - 1)
    def _():
        # z = (1 + eps) * h + agg
        z = selfscale_ref[...] * h_ref[...] + acc_ref[...]
        # GIN mlp with eval BatchNorm folded into (w1', b1'): Linear -> BN -> ReLU
        t = jnp.dot(z, w1_ref[...], preferred_element_type=jnp.float32,
                    precision=EPILOGUE_PRECISION) + b1_ref[...]
        t = jnp.maximum(t, 0.0)
        # mlp tail Linear(2E, E) with outer GNN_node BatchNorm folded into (w2', b2')
        o = jnp.dot(t, w2_ref[...], preferred_element_type=jnp.float32,
                    precision=EPILOGUE_PRECISION) + b2_ref[...]
        if final_relu:                         # non-last layers end with relu
            o = jnp.maximum(o, 0.0)
            o_ref[...] = o
            or_ref[...] = o.astype(jnp.bfloat16)       # relu(h) for next layer
        else:                                  # last layer (hr output unused)
            o_ref[...] = o
            or_ref[...] = jnp.maximum(o, 0.0).astype(jnp.bfloat16)


def gin_layer(h, hr, adj, lp, tile_dst, tile_src, *, final_relu):
    n_pad, e_pad = h.shape
    hid_pad = lp["w1"].shape[1]
    n_dst = n_pad // tile_dst
    n_src = n_pad // tile_src

    flops = 2 * n_pad * n_pad * e_pad + 4 * n_pad * e_pad * hid_pad
    bytes_accessed = (2 * n_pad * n_pad                     # bf16 adjacency stream
                      + 2 * n_pad * e_pad * n_dst           # bf16 hr re-read per dst tile
                      + 4 * n_pad * e_pad                   # f32 h (resident per dst tile)
                      + 4 * n_pad * e_pad + 2 * n_pad * e_pad   # outputs (f32 h, bf16 hr)
                      + 4 * (2 * e_pad * hid_pad + hid_pad + 2 * e_pad))

    kernel = functools.partial(gin_layer_kernel, final_relu=final_relu)
    return pl.pallas_call(
        kernel,
        out_shape=(jax.ShapeDtypeStruct((n_pad, e_pad), jnp.float32),
                   jax.ShapeDtypeStruct((n_pad, e_pad), jnp.bfloat16)),
        grid_spec=pltpu.PrefetchScalarGridSpec(
            num_scalar_prefetch=0,
            grid=(n_dst, n_src),                 # (dst tiles, src/reduction tiles)
            in_specs=[
                pl.BlockSpec((1, e_pad), lambda i, k: (0, 0)),          # (1+eps) row
                pl.BlockSpec((tile_dst, e_pad), lambda i, k: (i, 0)),   # h (dst tile, f32)
                pl.BlockSpec((tile_dst, tile_src), lambda i, k: (i, k)),  # adj tile (bf16)
                pl.BlockSpec((tile_src, e_pad), lambda i, k: (k, 0)),   # relu(h) (src, bf16)
                pl.BlockSpec((e_pad, hid_pad), lambda i, k: (0, 0)),    # w1' (BN folded)
                pl.BlockSpec((1, hid_pad), lambda i, k: (0, 0)),        # b1'
                pl.BlockSpec((hid_pad, e_pad), lambda i, k: (0, 0)),    # w2' (BN folded)
                pl.BlockSpec((1, e_pad), lambda i, k: (0, 0)),          # b2'
            ],
            out_specs=[
                pl.BlockSpec((tile_dst, e_pad), lambda i, k: (i, 0)),   # h out (f32)
                pl.BlockSpec((tile_dst, e_pad), lambda i, k: (i, 0)),   # relu(h) out (bf16)
            ],
            scratch_shapes=[pltpu.VMEM((tile_dst, e_pad), jnp.float32)],  # agg accumulator
        ),
        compiler_params=pltpu.CompilerParams(
            dimension_semantics=("parallel", "arbitrary"),
            vmem_limit_bytes=VMEM_LIMIT),
        cost_estimate=pl.CostEstimate(flops=int(flops), transcendentals=0,
                                      bytes_accessed=int(bytes_accessed)),
    )(lp["selfscale"], h, adj, hr, lp["w1"], lp["b1"], lp["w2"], lp["b2"])


# ------------------------------ parameters -----------------------------------

def _bn_affine(dim, bn_eps=1e-5):
    # torch BatchNorm1d defaults: gamma=1, beta=0, running_mean=0, running_var=1
    gamma = jnp.ones((dim,), jnp.float32)
    beta = jnp.zeros((dim,), jnp.float32)
    rm = jnp.zeros((dim,), jnp.float32)
    rv = jnp.ones((dim,), jnp.float32)
    scale = gamma / jnp.sqrt(rv + bn_eps)
    shift = beta - rm * scale
    return scale, shift


def _fold_and_pad_linear(w, b, scale, shift, in_pad, out_pad):
    # (x @ w + b) * scale + shift  ==  x @ (w*scale) + (b*scale + shift)
    wf = w * scale[None, :]
    bf = b * scale + shift
    wp = jnp.zeros((in_pad, out_pad), jnp.float32).at[:w.shape[0], :w.shape[1]].set(wf)
    bp = jnp.zeros((1, out_pad), jnp.float32).at[0, :b.shape[0]].set(bf)
    return wp, bp


def init_params(key, input_dim, emb_dim, num_layer):
    e_pad = _round_up(emb_dim, LANE)
    hid_pad = _round_up(2 * emb_dim, LANE)
    keys = jax.random.split(key, 2 + 4 * num_layer)

    enc_w = 0.1 * jax.random.normal(keys[0], (input_dim, emb_dim), jnp.float32)
    enc_b = 0.1 * jax.random.normal(keys[1], (emb_dim,), jnp.float32)
    params = {
        "enc_w": jnp.zeros((input_dim, e_pad), jnp.float32).at[:, :emb_dim].set(enc_w),
        "enc_b": jnp.zeros((1, e_pad), jnp.float32).at[0, :emb_dim].set(enc_b),
        "layers": [],
    }
    for layer in range(num_layer):
        k0, k1, k2, k3 = keys[2 + 4 * layer: 6 + 4 * layer]
        w1 = 0.1 * jax.random.normal(k0, (emb_dim, 2 * emb_dim), jnp.float32)
        b1 = 0.1 * jax.random.normal(k1, (2 * emb_dim,), jnp.float32)
        w2 = 0.1 * jax.random.normal(k2, (2 * emb_dim, emb_dim), jnp.float32)
        b2 = 0.1 * jax.random.normal(k3, (emb_dim,), jnp.float32)
        s1, t1 = _bn_affine(2 * emb_dim)     # BN inside GIN mlp (eval, running stats)
        s2, t2 = _bn_affine(emb_dim)         # GNN_node batch_norms[layer]
        w1p, b1p = _fold_and_pad_linear(w1, b1, s1, t1, e_pad, hid_pad)
        w2p, b2p = _fold_and_pad_linear(w2, b2, s2, t2, hid_pad, e_pad)
        eps = jnp.float32(0.0)               # GIN eps init = 0 (learnable scalar)
        params["layers"].append({
            "selfscale": (1.0 + eps) * jnp.ones((1, e_pad), jnp.float32),
            "w1": w1p, "b1": b1p, "w2": w2p, "b2": b2p,
        })
    return params


# ------------------------------ forward pass ---------------------------------

def gnn_node_forward(x, edge_index, params, num_layer, emb_dim):
    n, in_dim = x.shape
    n_pad, tile_dst, tile_src = _choose_tiles(n)
    e_pad = params["enc_w"].shape[1]

    # Pad node rows with zeros. Padded nodes have no edges (adj columns are 0),
    # so they never influence real nodes; their garbage outputs are sliced off.
    x_p = jnp.zeros((n_pad, in_dim), jnp.float32).at[:n, :].set(x)

    src = edge_index[0]          # x_j is gathered from edge_index[0]
    dst = edge_index[1]          # aggregated at edge_index[1]
    # Dense adjacency with multi-edge counts (matches scatter-add semantics),
    # built directly in bf16 (exact for counts < 256, no f32 N^2 intermediate).
    adj = (jnp.zeros((n_pad, n_pad), jnp.bfloat16)
           .at[dst, src].add(jnp.ones((src.shape[0],), jnp.bfloat16)))

    h, hr = node_encoder(x_p, params["enc_w"], params["enc_b"], tile_dst)
    for layer in range(num_layer):
        is_last = layer == num_layer - 1
        h, hr = gin_layer(h, hr, adj, params["layers"][layer],
                          tile_dst, tile_src, final_relu=not is_last)
        # F.dropout is identity in eval mode; residual=False; JK='last'.
    return h[:n, :emb_dim]


# ------------------------------ reference ------------------------------------

def _reference_forward(x, edge_index, params, num_layer, emb_dim):
    # Pure-JAX eval-mode reference (unpadded f32 math, BN already folded).
    e = emb_dim
    n = x.shape[0]
    src, dst = edge_index[0], edge_index[1]
    mm = functools.partial(jnp.matmul, precision=jax.lax.Precision.HIGHEST)
    h = mm(x, params["enc_w"][:, :e]) + params["enc_b"][0, :e]
    for layer in range(num_layer):
        lp = params["layers"][layer]
        msg = jnp.maximum(h, 0.0)[src]                         # relu(x_j)
        agg = jnp.zeros((n, e), jnp.float32).at[dst].add(msg)  # add-aggregation
        z = lp["selfscale"][0, :e] * h + agg
        t = jnp.maximum(mm(z, lp["w1"][:e, :2 * e]) + lp["b1"][0, :2 * e], 0.0)
        o = mm(t, lp["w2"][:2 * e, :e]) + lp["b2"][0, :e]
        if layer != num_layer - 1:
            o = jnp.maximum(o, 0.0)
        h = o
    return h


# ---------------------------------- main --------------------------------------

if __name__ == "__main__":
    N, INPUT_DIM, EMB_DIM, NUM_LAYER, NUM_EDGES = 16, 8, 32, 2, 40

    key = jax.random.PRNGKey(0)
    kx, ke, kp = jax.random.split(key, 3)
    x = jax.random.normal(kx, (N, INPUT_DIM), jnp.float32)
    edge_index = jax.random.randint(ke, (2, NUM_EDGES), 0, N, dtype=jnp.int32)
    # edge_attr is unused when edge_dim == -1 (GIN message ignores it).

    params = init_params(kp, INPUT_DIM, EMB_DIM, NUM_LAYER)

    out = gnn_node_forward(x, edge_index, params, NUM_LAYER, EMB_DIM)
    out = jax.block_until_ready(out)
    assert out.shape == (N, EMB_DIM) and out.dtype == jnp.float32

    ref = jax.block_until_ready(
        _reference_forward(x, edge_index, params, NUM_LAYER, EMB_DIM))
    # relu(h) is carried in bf16 for the aggregation matmul, so allow bf16-level
    # deviation from the pure-f32 reference.
    max_err = float(jnp.max(jnp.abs(out - ref)))
    assert jnp.allclose(out, ref, rtol=2e-2, atol=2e-2), (
        "max abs err = %e" % max_err)

    print("KERNEL_OK")
</pallas_src>

<mosaic_0001>
module attributes {stable_mosaic.version = 11 : i64} {
  func.func @node_encoder_kernel(%arg0: i32, %arg1: memref<256x8xf32, #tpu.memory_space<vmem>>, %arg2: memref<8x128xf32, #tpu.memory_space<vmem>>, %arg3: memref<1x128xf32, #tpu.memory_space<vmem>>, %arg4: memref<256x128xf32, #tpu.memory_space<vmem>>, %arg5: memref<256x128xbf16, #tpu.memory_space<vmem>>) attributes {dimension_semantics = [#tpu.dimension_semantics<parallel>], iteration_bounds = array<i64: 1>, scalar_prefetch = 0 : i64, scratch_operands = 0 : i64, tpu.core_type = #tpu.core_type<tc>, window_params = [{transform_indices = @transform_0, window_bounds = array<i64: 256, 8>}, {pipeline_mode = #tpu.pipeline_mode<synchronous>, transform_indices = @transform_1, window_bounds = array<i64: 8, 128>}, {pipeline_mode = #tpu.pipeline_mode<synchronous>, transform_indices = @transform_2, window_bounds = array<i64: 1, 128>}, {transform_indices = @transform_3, window_bounds = array<i64: 256, 128>}, {transform_indices = @transform_4, window_bounds = array<i64: 256, 128>}]} {
    %c0 = arith.constant 0 : index
    %c0_0 = arith.constant 0 : index
    %0 = vector.load %arg1[%c0, %c0_0] : memref<256x8xf32, #tpu.memory_space<vmem>>, vector<256x8xf32>
    %c0_1 = arith.constant 0 : index
    %c0_2 = arith.constant 0 : index
    %1 = vector.load %arg2[%c0_1, %c0_2] : memref<8x128xf32, #tpu.memory_space<vmem>>, vector<8x128xf32>
    %cst = arith.constant dense<0.000000e+00> : vector<256x128xf32>
    %2 = tpu.matmul %0, %1, %cst {dimension_numbers = #tpu.dot_dimension_numbers<[1], [0], [0], [1], [0, 0, 1, 1], [], []>, precision = #tpu.contract_precision<fp32>} : vector<256x8xf32>, vector<8x128xf32>, vector<256x128xf32> -> vector<256x128xf32>
    %c0_3 = arith.constant 0 : index
    %c0_4 = arith.constant 0 : index
    %3 = vector.load %arg3[%c0_3, %c0_4] : memref<1x128xf32, #tpu.memory_space<vmem>>, vector<1x128xf32>
    %4 = vector.broadcast %3 : vector<1x128xf32> to vector<256x128xf32>
    %5 = arith.addf %2, %4 : vector<256x128xf32>
    %c0_5 = arith.constant 0 : index
    %c0_6 = arith.constant 0 : index
    %6 = vector.load %arg4[%c0_5, %c0_6] : memref<256x128xf32, #tpu.memory_space<vmem>>, vector<256x128xf32>
    tpu.vector_store %arg4[%c0_5, %c0_6], %5 {strides = array<i32>} : memref<256x128xf32, #tpu.memory_space<vmem>>, vector<256x128xf32>,
    %cst_7 = arith.constant 0.000000e+00 : f32
    %7 = vector.broadcast %cst_7 : f32 to vector<256x128xf32>
    %8 = arith.maximumf %5, %7 : vector<256x128xf32>
    %9 = arith.truncf %8 : vector<256x128xf32> to vector<256x128xbf16>
    %c0_8 = arith.constant 0 : index
    %c0_9 = arith.constant 0 : index
    %10 = vector.load %arg5[%c0_8, %c0_9] : memref<256x128xbf16, #tpu.memory_space<vmem>>, vector<256x128xbf16>
    tpu.vector_store %arg5[%c0_8, %c0_9], %9 {strides = array<i32>} : memref<256x128xbf16, #tpu.memory_space<vmem>>, vector<256x128xbf16>,
    return
  }
  func.func @transform_0(%arg0: i32) -> (i32, i32) {
    %c0_i32 = arith.constant 0 : i32
    %c0_i32_0 = arith.constant 0 : i32
    return %arg0, %c0_i32 : i32, i32
  }
  func.func @transform_1(%arg0: i32) -> (i32, i32) {
    %c0_i32 = arith.constant 0 : i32
    %c0_i32_0 = arith.constant 0 : i32
    %c0_i32_1 = arith.constant 0 : i32
    return %c0_i32, %c0_i32_0 : i32, i32
  }
  func.func @transform_2(%arg0: i32) -> (i32, i32) {
    %c0_i32 = arith.constant 0 : i32
    %c0_i32_0 = arith.constant 0 : i32
    %c0_i32_1 = arith.constant 0 : i32
    return %c0_i32, %c0_i32_0 : i32, i32
  }
  func.func @transform_3(%arg0: i32) -> (i32, i32) {
    %c0_i32 = arith.constant 0 : i32
    %c0_i32_0 = arith.constant 0 : i32
    return %arg0, %c0_i32 : i32, i32
  }
  func.func @transform_4(%arg0: i32) -> (i32, i32) {
    %c0_i32 = arith.constant 0 : i32
    %c0_i32_0 = arith.constant 0 : i32
    return %arg0, %c0_i32 : i32, i32
  }
}

</mosaic_0001>

<bundles_post_ra>
// kernel: tpu_custom_call.1
= control target key start
LH: loop header
LB: loop body
LE: loop exit
PB: predicated region body
PF: predicated region fallthrough
CT: control target
= control target key end

     0   :  { %10 = vsyncpa [#allocation3], 0  ;;  %vm55_vm0 = vcmask 64512   ;;  %s2408_s0 = inlined_call_operand.vmem [shape: f32[256,8], index: 0, kind: input, shape index: {}]   ;;  %s2409_s1 = inlined_call_operand.vmem [shape: f32[8,128], index: 1, kind: input, shape index: {}]   ;;  %s2410_s2 = inlined_call_operand.vmem [shape: f32[1,128], index: 2, kind: input, shape index: {}]   ;;  %s2411_s3 = inlined_call_operand.hbm [shape: f32[256,128], index: 3, kind: output, shape index: {0}]   ;;  %s2412_s4 = inlined_call_operand.hbm [shape: bf16[256,128], index: 4, kind: output, shape index: {1}]  }
   0x1   :  { %v50_v0 = vld [vmem:[%s2409_s1] sm:$0xff]  ;;  %v35_v2 = vld [vmem:[%s2408_s0 + $0x88] sm:$0xff]  ;;  %v36_v11 = vld [vmem:[%s2408_s0 + $0x90] sm:$0xff] }
   0x2   :  { %v34_v1 = vld [vmem:[%s2408_s0 + $0x80] sm:$0xff]  ;;  %v167_v3 = vand.u32 4294901760, %v50_v0  ;;  %v108_v5 = vsel %vm55_vm0, %v35_v2, 0  ;;  %v19_v7 = vld [vmem:[%s2408_s0 + $0x8] sm:$0xff]  ;;  %v20_v15 = vld [vmem:[%s2408_s0 + $0x10] sm:$0xff] }
   0x3   :  { %v105_v4 = vsel %vm55_vm0, %v34_v1, 0  ;;  %v18_v6 = vld [vmem:[%s2408_s0] sm:$0xff]  ;;  %v1629_v9 = vand.u32 4294901760, %v108_v5  ;;  %v60_v14 = vsel %vm55_vm0, %v19_v7, 0 }
   0x4   :  { %v1627_v8 = vand.u32 4294901760, %v105_v4  ;;  %v57_v10 = vsel %vm55_vm0, %v18_v6, 0  ;;  %1518 = vmatpush.msra.mxu2 %v167_v3  ;;  %v442_v12 = vsub.f32 %v50_v0, %v167_v3  ;;  %168 = vmatpush.msra.mxu0 %v167_v3  ;;  %v1647_v18 = vand.u32 4294901760, %v60_v14 }
   0x5   :  { %v1635_v13 = vand.u32 4294901760, %v57_v10  ;;  %v1645_v17 = vsub.f32 %v108_v5, %v1629_v9 }
   0x6   :  { %v1642_v16 = vsub.f32 %v105_v4, %v1627_v8 }
   0x7   :  { %11 = vsyncpa [#allocation5], 0  ;;  %593 = vmatpush.msrb.mxu2 %v442_v12  ;;  %v443_v19 = vand.u32 4294901760, %v442_v12  ;;  %v1650_v20 = vsub.f32 %v57_v10, %v1635_v13  ;;  %v111_v21 = vsel %vm55_vm0, %v36_v11, 0  ;;  %v1655_v23 = vsub.f32 %v60_v14, %v1647_v18  ;;  %v37_v35 = vld [vmem:[%s2408_s0 + $0x98] sm:$0xff]  ;;  %v38_v50 = vld [vmem:[%s2408_s0 + $0xa0] sm:$0xff] }
   0x8   :  { %v2421_v22 = vand.u32 4294901760, %v1642_v16  ;;  %v63_v24 = vsel %vm55_vm0, %v20_v15, 0  ;;  %v2420_v28 = vand.u32 4294901760, %v1645_v17  ;;  %v1663_v29 = vand.u32 4294901760, %v111_v21  ;;  %v21_v37 = vld [vmem:[%s2408_s0 + $0x18] sm:$0xff]  ;;  %v22_v51 = vld [vmem:[%s2408_s0 + $0x20] sm:$0xff] }
   0x9   :  { %v444_v25 = vsub.f32 %v442_v12, %v443_v19  ;;  %v2434_v26 = vand.u32 4294901760, %v1650_v20  ;;  %983 = vmatpush.msrb.mxu0 %v443_v19  ;;  %v2433_v32 = vand.u32 4294901760, %v1655_v23  ;;  %v1669_v33 = vand.u32 4294901760, %v63_v24  ;;  %v39_v0 = vld [vmem:[%s2408_s0 + $0xa8] sm:$0xff]  ;;  %s1393_s30 = sshll.u32 %s2411_s3, 4  ;;  %s1580_s5 = smov [#allocation4]   ;;  %s1394_s30 = int_to_ptr.hbm [resolvable:$true] %s1393_s30 }
   0xa   :  { %v300_v27 = vsub.f32 %v1642_v16, %v2421_v22  ;;  %v308_v38 = vsub.f32 %v1645_v17, %v2420_v28  ;;  %v1682_v39 = vsub.f32 %v111_v21, %v1663_v29  ;;  %v114_v41 = vsel %vm55_vm0, %v37_v35, 0  ;;  %v23_v1 = vld [vmem:[%s2408_s0 + $0x28] sm:$0xff]  ;;  %v40_v21 = vld [vmem:[%s2408_s0 + $0xb0] sm:$0xff]  ;;  %s1404_s6 = sshll.u32 %s1580_s5, 4  ;;  %s1406_s9 = sshll.u32 %s2412_s4, 4  ;;  %s1405_s6 = int_to_ptr.vmem [resolvable:$true] %s1404_s6  ;;  %s1407_s9 = int_to_ptr.hbm [resolvable:$true] %s1406_s9 }
   0xb   :  { %v445_v30 = vand.u32 4294901760, %v444_v25  ;;  %v172_v31 = vsub.f32 %v1650_v20, %v2434_v26  ;;  %v180_v40 = vsub.f32 %v1655_v23, %v2433_v32  ;;  %v1689_v42 = vsub.f32 %v63_v24, %v1669_v33  ;;  %v24_v24 = vld [vmem:[%s2408_s0 + $0x30] sm:$0xff]  ;;  %s1581_s10 = smov 128   ;;  %s1582_s11 = smov 8  }
   0xc   :  { %v301_v34 = vand.u32 4294901760, %v300_v27  ;;  %v66_v43 = vsel %vm55_vm0, %v21_v37, 0  ;;  %v309_v44 = vand.u32 4294901760, %v308_v38  ;;  %v2419_v45 = vand.u32 4294901760, %v1682_v39  ;;  %s1583_s3 = smov 64   ;;  %s1584_s12 = smov 4  }
   0xd   :  { %1519 = vmatpush.msra.mxu3 %v445_v30  ;;  %v173_v36 = vand.u32 4294901760, %v172_v31  ;;  %446 = vmatpush.msra.mxu1 %v445_v30  ;;  %v1694_v46 = vand.u32 4294901760, %v114_v41  ;;  %v181_v47 = vand.u32 4294901760, %v180_v40  ;;  %v2431_v48 = vand.u32 4294901760, %v1689_v42 }
   0xe   :  { %302 = vmatmul.f32.vlgmr.msra.gmra.mxu2 %v301_v34  ;;  %512 = vmatmul.f32.vlgmr.msra.gmra.mxu3 %v1627_v8  ;;  %v1697_v49 = vand.u32 4294901760, %v66_v43  ;;  %v316_v52 = vsub.f32 %v1682_v39, %v2419_v45  ;;  %v117_v55 = vsel %vm55_vm0, %v38_v50, 0  ;;  %v69_v57 = vsel %vm55_vm0, %v22_v51, 0 }
   0xf   :  { %771 = vmatpush.msrb.mxu3 %v167_v3  ;;  %174 = vmatmul.f32.vlgmr.msra.gmra.mxu0 %v173_v36  ;;  %v1710_v53 = vsub.f32 %v114_v41, %v1694_v46  ;;  %v188_v54 = vsub.f32 %v1689_v42, %v2431_v48  ;;  %v1722_v60 = vand.u32 4294901760, %v117_v55  ;;  %v1725_v63 = vand.u32 4294901760, %v69_v57 }
  0x10   :  { %448 = vmatmul.f32.vlgmr.msra.gmra.mxu1 %v1635_v13  ;;  %v1717_v56 = vsub.f32 %v66_v43, %v1697_v49  ;;  %v317_v58 = vand.u32 4294901760, %v316_v52  ;;  %v120_v5 = vsel %vm55_vm0, %v39_v0, 0  ;;  %v72_v7 = vsel %vm55_vm0, %v23_v1, 0 }
  0x11   :  { %1129 = vmatpush.msrb.mxu1 %v167_v3  ;;  %v2418_v59 = vand.u32 4294901760, %v1710_v53  ;;  %v189_v61 = vand.u32 4294901760, %v188_v54  ;;  %v1738_v3 = vsub.f32 %v117_v55, %v1722_v60  ;;  %v1745_v6 = vsub.f32 %v69_v57, %v1725_v63 }
  0x12   :  { %v2430_v62 = vand.u32 4294901760, %v1717_v56  ;;  %v1750_v12 = vand.u32 4294901760, %v120_v5  ;;  %v1753_v19 = vand.u32 4294901760, %v72_v7  ;;  %v123_v31 = vsel %vm55_vm0, %v40_v21, 0 }
  0x13   :  { %v324_v2 = vsub.f32 %v1710_v53, %v2418_v59  ;;  %v2416_v11 = vand.u32 4294901760, %v1738_v3  ;;  %v2428_v15 = vand.u32 4294901760, %v1745_v6  ;;  %v75_v35 = vsel %vm55_vm0, %v24_v24, 0 }
  0x14   :  { %v196_v4 = vsub.f32 %v1717_v56, %v2430_v62  ;;  %v1766_v27 = vsub.f32 %v120_v5, %v1750_v12  ;;  %v1773_v34 = vsub.f32 %v72_v7, %v1753_v19  ;;  %v1778_v38 = vand.u32 4294901760, %v123_v31  ;;  %v42_v5 = vld [vmem:[%s2408_s0 + $0xc0] sm:$0xff] }
  0x15   :  { %v325_v10 = vand.u32 4294901760, %v324_v2  ;;  %v332_v25 = vsub.f32 %v1738_v3, %v2416_v11  ;;  %v204_v30 = vsub.f32 %v1745_v6, %v2428_v15  ;;  %v1781_v43 = vand.u32 4294901760, %v75_v35  ;;  %v26_v7 = vld [vmem:[%s2408_s0 + $0x40] sm:$0xff] }
  0x16   :  { %310 = vmatmul.f32.gmra.mxu2 %v309_v44  ;;  %516 = vmatmul.f32.gmra.mxu3 %v1629_v9  ;;  %v197_v14 = vand.u32 4294901760, %v196_v4  ;;  %v2415_v37 = vand.u32 4294901760, %v1766_v27  ;;  %v2427_v41 = vand.u32 4294901760, %v1773_v34  ;;  %v41_v44 = vld [vmem:[%s2408_s0 + $0xb8] sm:$0xff]  ;;  %v1794_v51 = vsub.f32 %v123_v31, %v1778_v38 }
  0x17   :  { %182 = vmatmul.f32.gmra.mxu0 %v181_v47  ;;  %v333_v36 = vand.u32 4294901760, %v332_v25  ;;  %v205_v40 = vand.u32 4294901760, %v204_v30  ;;  %v25_v47 = vld [vmem:[%s2408_s0 + $0x38] sm:$0xff]  ;;  %v126_v54 = vsel %vm55_vm0, %v41_v44, 0  ;;  %v1801_v55 = vsub.f32 %v75_v35, %v1781_v43 }
  0x18   :  { %452 = vmatmul.f32.gmra.mxu1 %v1647_v18  ;;  %v340_v50 = vsub.f32 %v1766_v27, %v2415_v37  ;;  %v212_v52 = vsub.f32 %v1773_v34, %v2427_v41  ;;  %v78_v57 = vsel %vm55_vm0, %v25_v47, 0  ;;  %v1806_v0 = vand.u32 4294901760, %v126_v54 }
  0x19   :  { %v2425_v2 = vand.u32 4294901760, %v1801_v55  ;;  %v1809_v4 = vand.u32 4294901760, %v78_v57  ;;  %v129_v24 = vsel %vm55_vm0, %v42_v5, 0  ;;  %v81_v30 = vsel %vm55_vm0, %v26_v7, 0 }
  0x1a   :  { %v213_v1 = vand.u32 4294901760, %v212_v52  ;;  %v1837_v47 = vand.u32 4294901760, %v81_v30  ;;  %v27_v52 = vld [vmem:[%s2408_s0 + $0x48] sm:$0xff] }
  0x1b   :  { %v220_v21 = vsub.f32 %v1801_v55, %v2425_v2  ;;  %v1829_v25 = vsub.f32 %v78_v57, %v1809_v4  ;;  %v84_v7 = vsel %vm55_vm0, %v27_v52, 0 }
  0x1c   :  { %v1857_v5 = vsub.f32 %v81_v30, %v1837_v47  ;;  %v28_v30 = vld [vmem:[%s2408_s0 + $0x50] sm:$0xff] }
  0x1d   :  { %v2424_v44 = vand.u32 4294901760, %v1829_v25 }
  0x1e   :  { %318 = vmatmul.f32.gmra.mxu2 %v317_v58  ;;  %520 = vmatmul.f32.gmra.mxu3 %v1663_v29  ;;  %v341_v58 = vand.u32 4294901760, %v340_v50  ;;  %v43_v50 = vld [vmem:[%s2408_s0 + $0xc8] sm:$0xff] }
  0x1f   :  { %190 = vmatmul.f32.gmra.mxu0 %v189_v61  ;;  %v2414_v61 = vand.u32 4294901760, %v1794_v51 }
  0x20   :  { %456 = vmatmul.f32.gmra.mxu1 %v1669_v33 }
  0x26   :  { %326 = vmatmul.f32.gmra.mxu2 %v325_v10  ;;  %524 = vmatmul.f32.gmra.mxu3 %v1694_v46  ;;  %v348_v10 = vsub.f32 %v1794_v51, %v2414_v61 }
  0x27   :  { %198 = vmatmul.f32.gmra.mxu0 %v197_v14  ;;  %v1822_v14 = vsub.f32 %v126_v54, %v1806_v0 }
  0x28   :  { %460 = vmatmul.f32.gmra.mxu1 %v1697_v49  ;;  %v349_v31 = vand.u32 4294901760, %v348_v10 }
  0x29   :  { %v2413_v35 = vand.u32 4294901760, %v1822_v14 }
  0x2b   :  { %v356_v54 = vsub.f32 %v1822_v14, %v2413_v35  ;;  %v1865_v35 = vand.u32 4294901760, %v84_v7 }
  0x2d   :  { %v357_v10 = vand.u32 4294901760, %v356_v54  ;;  %v1885_v37 = vsub.f32 %v84_v7, %v1865_v35  ;;  %v29_v7 = vld [vmem:[%s2408_s0 + $0x58] sm:$0xff] }
  0x2e   :  { %334 = vmatmul.f32.gmra.mxu2 %v333_v36  ;;  %528 = vmatmul.f32.gmra.mxu3 %v1722_v60  ;;  %v1834_v36 = vand.u32 4294901760, %v129_v24 }
  0x2f   :  { %206 = vmatmul.f32.gmra.mxu0 %v205_v40  ;;  %v221_v40 = vand.u32 4294901760, %v220_v21 }
  0x30   :  { %464 = vmatmul.f32.gmra.mxu1 %v1725_v63  ;;  %2469 = vst [vmem:[#allocation8_spill] sm:$0xff] %v1834_v36  ;;  %v1850_v57 = vsub.f32 %v129_v24, %v1834_v36 }
  0x32   :  { %v2417_v21 = vand.u32 4294901760, %v1850_v57 }
  0x34   :  { %v364_v52 = vsub.f32 %v1850_v57, %v2417_v21 }
  0x36   :  { %342 = vmatmul.f32.gmra.mxu2 %v341_v58  ;;  %532 = vmatmul.f32.gmra.mxu3 %v1750_v12  ;;  %v228_v58 = vsub.f32 %v1829_v25, %v2424_v44  ;;  %v365_v11 = vand.u32 4294901760, %v364_v52 }
  0x37   :  { %214 = vmatmul.f32.gmra.mxu0 %v213_v1  ;;  %v132_v1 = vsel %vm55_vm0, %v43_v50, 0  ;;  %v44_v50 = vld [vmem:[%s2408_s0 + $0xd0] sm:$0xff] }
  0x38   :  { %468 = vmatmul.f32.gmra.mxu1 %v1753_v19  ;;  %v229_v24 = vand.u32 4294901760, %v228_v58  ;;  %v135_v61 = vsel %vm55_vm0, %v44_v50, 0  ;;  %v45_v50 = vld [vmem:[%s2408_s0 + $0xd8] sm:$0xff] }
  0x39   :  { %v1890_v59 = vand.u32 4294901760, %v135_v61  ;;  %v138_v28 = vsel %vm55_vm0, %v45_v50, 0  ;;  %v46_v50 = vld [vmem:[%s2408_s0 + $0xe0] sm:$0xff] }
  0x3a   :  { %v1918_v44 = vand.u32 4294901760, %v138_v28 }
  0x3b   :  { %2472 = vst [vmem:[#allocation11_spill] sm:$0xff] %v1890_v59  ;;  %v1906_v52 = vsub.f32 %v135_v61, %v1890_v59 }
  0x3c   :  { %2474 = vst [vmem:[#allocation13_spill] sm:$0xff] %v1918_v44 }
  0x3d   :  { %2473 = vst [vmem:[#allocation12_spill] sm:$0xff] %v1906_v52 }
  0x3e   :  { %350 = vmatmul.f32.gmra.mxu2 %v349_v31  ;;  %536 = vmatmul.f32.gmra.mxu3 %v1778_v38  ;;  %v1862_v31 = vand.u32 4294901760, %v132_v1 }
  0x3f   :  { %222 = vmatmul.f32.gmra.mxu0 %v221_v40  ;;  %v2422_v40 = vand.u32 4294901760, %v1857_v5 }
  0x40   :  { %472 = vmatmul.f32.gmra.mxu1 %v1781_v43  ;;  %2470 = vst [vmem:[#allocation9_spill] sm:$0xff] %v1862_v31  ;;  %v1878_v54 = vsub.f32 %v132_v1, %v1862_v31 }
  0x41   :  { %v236_v58 = vsub.f32 %v1857_v5, %v2422_v40 }
  0x42   :  { %2471 = vst [vmem:[#allocation10_spill] sm:$0xff] %v1878_v54  ;;  %v2423_v21 = vand.u32 4294901760, %v1878_v54 }
  0x43   :  { %v237_v1 = vand.u32 4294901760, %v236_v58 }
  0x46   :  { %358 = vmatmul.f32.gmra.mxu2 %v357_v10  ;;  %540 = vmatmul.f32.gmra.mxu3 %v1806_v0  ;;  %v87_v10 = vsel %vm55_vm0, %v28_v30, 0  ;;  %v372_v30 = vsub.f32 %v1878_v54, %v2423_v21  ;;  %v2429_v21 = vand.u32 4294901760, %v1906_v52 }
  0x47   :  { %230 = vmatmul.f32.gmra.mxu0 %v229_v24  ;;  %v2426_v24 = vand.u32 4294901760, %v1885_v37  ;;  %v1893_v45 = vand.u32 4294901760, %v87_v10 }
  0x48   :  { %476 = vmatmul.f32.gmra.mxu1 %v1809_v4  ;;  %v373_v40 = vand.u32 4294901760, %v372_v30  ;;  %v1934_v30 = vsub.f32 %v138_v28, %v1918_v44 }
  0x49   :  { %v244_v58 = vsub.f32 %v1885_v37, %v2426_v24  ;;  %v1913_v22 = vsub.f32 %v87_v10, %v1893_v45  ;;  %v30_v10 = vld [vmem:[%s2408_s0 + $0x60] sm:$0xff]  ;;  %v141_v24 = vsel %vm55_vm0, %v46_v50, 0  ;;  %v47_v50 = vld [vmem:[%s2408_s0 + $0xe8] sm:$0xff] }
  0x4a   :  { %2475 = vst [vmem:[#allocation14_spill] sm:$0xff] %v1934_v30  ;;  %v1946_v62 = vand.u32 4294901760, %v141_v24 }
  0x4b   :  { %v245_v61 = vand.u32 4294901760, %v244_v58 }
  0x4c   :  { %2476 = vst [vmem:[#allocation15_spill] sm:$0xff] %v1946_v62 }
  0x4e   :  { %366 = vmatmul.f32.gmra.mxu2 %v365_v11  ;;  %544 = vmatmul.f32.gmra.mxu3 %v1834_v36  ;;  %v90_v11 = vsel %vm55_vm0, %v29_v7, 0  ;;  %v380_v7 = vsub.f32 %v1906_v52, %v2429_v21  ;;  %v2435_v21 = vand.u32 4294901760, %v1934_v30 }
  0x4f   :  { %238 = vmatmul.f32.gmra.mxu0 %v237_v1  ;;  %v2432_v1 = vand.u32 4294901760, %v1913_v22  ;;  %v1921_v2 = vand.u32 4294901760, %v90_v11 }
  0x50   :  { %480 = vmatmul.f32.gmra.mxu1 %v1837_v47  ;;  %v381_v15 = vand.u32 4294901760, %v380_v7  ;;  %v1962_v7 = vsub.f32 %v141_v24, %v1946_v62 }
  0x51   :  { %v252_v58 = vsub.f32 %v1913_v22, %v2432_v1  ;;  %v1941_v41 = vsub.f32 %v90_v11, %v1921_v2  ;;  %v31_v11 = vld [vmem:[%s2408_s0 + $0x68] sm:$0xff]  ;;  %v144_v1 = vsel %vm55_vm0, %v47_v50, 0  ;;  %v48_v50 = vld [vmem:[%s2408_s0 + $0xf0] sm:$0xff] }
  0x52   :  { %2477 = vst [vmem:[#allocation16_spill] sm:$0xff] %v1962_v7 }
  0x53   :  { %v253_v28 = vand.u32 4294901760, %v252_v58 }
  0x56   :  { %374 = vmatmul.f32.gmra.mxu2 %v373_v40  ;;  %548 = vmatmul.f32.gmra.mxu3 %v1862_v31  ;;  %v93_v40 = vsel %vm55_vm0, %v30_v10, 0  ;;  %v388_v10 = vsub.f32 %v1934_v30, %v2435_v21  ;;  %v2445_v21 = vand.u32 4294901760, %v1962_v7  ;;  %v1974_v30 = vand.u32 4294901760, %v144_v1 }
  0x57   :  { %246 = vmatmul.f32.gmra.mxu0 %v245_v61  ;;  %v2440_v61 = vand.u32 4294901760, %v1941_v41  ;;  %v1949_v48 = vand.u32 4294901760, %v93_v40 }
  0x58   :  { %484 = vmatmul.f32.gmra.mxu1 %v1865_v35  ;;  %v389_v26 = vand.u32 4294901760, %v388_v10  ;;  %2478 = vst [vmem:[#allocation17_spill] sm:$0xff] %v1974_v30  ;;  %v1990_v10 = vsub.f32 %v144_v1, %v1974_v30 }
  0x59   :  { %v260_v58 = vsub.f32 %v1941_v41, %v2440_v61  ;;  %v1969_v32 = vsub.f32 %v93_v40, %v1949_v48  ;;  %v32_v40 = vld [vmem:[%s2408_s0 + $0x70] sm:$0xff]  ;;  %v147_v61 = vsel %vm55_vm0, %v48_v50, 0  ;;  %v49_v50 = vld [vmem:[%s2408_s0 + $0xf8] sm:$0xff] }
  0x5a   :  { %2479 = vst [vmem:[#allocation18_spill] sm:$0xff] %v1990_v10 }
  0x5b   :  { %v261_v24 = vand.u32 4294901760, %v260_v58 }
  0x5e   :  { %382 = vmatmul.f32.gmra.mxu2 %v381_v15  ;;  %552 = vmatmul.f32.gmra.mxu3 %v1890_v59  ;;  %v96_v15 = vsel %vm55_vm0, %v31_v11, 0  ;;  %v396_v11 = vsub.f32 %v1962_v7, %v2445_v21  ;;  %v2455_v21 = vand.u32 4294901760, %v1990_v10  ;;  %v2002_v7 = vand.u32 4294901760, %v147_v61 }
  0x5f   :  { %254 = vmatmul.f32.gmra.mxu0 %v253_v28  ;;  %v2450_v28 = vand.u32 4294901760, %v1969_v32  ;;  %v1977_v59 = vand.u32 4294901760, %v96_v15 }
  0x60   :  { %488 = vmatmul.f32.gmra.mxu1 %v1893_v45 }
  0x61   :  { %v268_v58 = vsub.f32 %v1969_v32, %v2450_v28  ;;  %v1997_v52 = vsub.f32 %v96_v15, %v1977_v59  ;;  %v33_v15 = vld [vmem:[%s2408_s0 + $0x78] sm:$0xff]  ;;  %v150_v28 = vsel %vm55_vm0, %v49_v50, 0 }
  0x63   :  { %v269_v1 = vand.u32 4294901760, %v268_v58 }
  0x66   :  { %390 = vmatmul.f32.gmra.mxu2 %v389_v26  ;;  %556 = vmatmul.f32.gmra.mxu3 %v1918_v44  ;;  %v99_v26 = vsel %vm55_vm0, %v32_v40, 0  ;;  %v397_v44 = vand.u32 4294901760, %v396_v11  ;;  %v404_v40 = vsub.f32 %v1990_v10, %v2455_v21  ;;  %v2018_v11 = vsub.f32 %v147_v61, %v2002_v7 }
  0x67   :  { %262 = vmatmul.f32.gmra.mxu0 %v261_v24  ;;  %v2460_v24 = vand.u32 4294901760, %v1997_v52  ;;  %v2005_v31 = vand.u32 4294901760, %v99_v26  ;;  %v2030_v10 = vand.u32 4294901760, %v150_v28 }
  0x68   :  { %492 = vmatmul.f32.gmra.mxu1 %v1921_v2  ;;  %v2464_v21 = vand.u32 4294901760, %v2018_v11 }
  0x69   :  { %v276_v58 = vsub.f32 %v1997_v52, %v2460_v24  ;;  %v2025_v54 = vsub.f32 %v99_v26, %v2005_v31  ;;  %2480 = vst [vmem:[#allocation19_spill] sm:$0xff] %v2030_v10  ;;  %v2040_v50 = vsub.f32 %v150_v28, %v2030_v10 }
  0x6a   :  { %v412_v26 = vsub.f32 %v2018_v11, %v2464_v21 }
  0x6b   :  { %v277_v61 = vand.u32 4294901760, %v276_v58  ;;  %v2463_v58 = vand.u32 4294901760, %v2040_v50 }
  0x6d   :  { %v420_v28 = vsub.f32 %v2040_v50, %v2463_v58 }
  0x6e   :  { %398 = vmatmul.f32.gmra.mxu2 %v397_v44  ;;  %560 = vmatmul.f32.gmra.mxu3 %v1946_v62  ;;  %v102_v44 = vsel %vm55_vm0, %v33_v15, 0  ;;  %v405_v62 = vand.u32 4294901760, %v404_v40 }
  0x6f   :  { %270 = vmatmul.f32.gmra.mxu0 %v269_v1  ;;  %v2466_v1 = vand.u32 4294901760, %v2025_v54  ;;  %v2033_v36 = vand.u32 4294901760, %v102_v44 }
  0x70   :  { %496 = vmatmul.f32.gmra.mxu1 %v1949_v48 }
  0x71   :  { %v284_v15 = vsub.f32 %v2025_v54, %v2466_v1  ;;  %v2046_v40 = vsub.f32 %v102_v44, %v2033_v36 }
  0x73   :  { %v285_v24 = vand.u32 4294901760, %v284_v15 }
  0x76   :  { %406 = vmatmul.f32.gmra.mxu2 %v405_v62  ;;  %564 = vmatmul.f32.gmra.mxu3 %v1974_v30  ;;  %v413_v62 = vand.u32 4294901760, %v412_v26  ;;  %v2465_v30 = vand.u32 4294901760, %v2046_v40 }
  0x77   :  { %278 = vmatmul.f32.gmra.mxu0 %v277_v61  ;;  %v421_v61 = vand.u32 4294901760, %v420_v28  ;;  %v2071_v28 = vld [vmem:[%s2410_s2] ss:$0 sm:$0xff]  ;;  %s1579_s2 = smov [#allocation2]  }
  0x78   :  { %500 = vmatmul.f32.gmra.mxu1 %v1977_v59  ;;  %v292_v44 = vsub.f32 %v2046_v40, %v2465_v30  ;;  %s1391_s27 = sshll.u32 %s1579_s2, 4  ;;  %s1392_s27 = int_to_ptr.vmem [resolvable:$true] %s1391_s27 }
  0x7a   :  { %v293_v26 = vand.u32 4294901760, %v292_v44 }
  0x7e   :  { %414 = vmatmul.f32.gmra.mxu2 %v413_v62  ;;  %568 = vmatmul.f32.gmra.mxu3 %v2002_v7 }
  0x7f   :  { %286 = vmatmul.f32.gmra.mxu0 %v285_v24  ;;  %v2481_v24 = vand.u32 4294901760, %v1650_v20 }
  0x80   :  { %504 = vmatmul.f32.gmra.mxu1 %v2005_v31 }
  0x86   :  { %422 = vmatmul.f32.gmra.mxu2 %v421_v61  ;;  %572 = vmatmul.f32.gmra.mxu3 %v2030_v10 }
  0x87   :  { %294 = vmatmul.f32.gmra.mxu0 %v293_v26 }
  0x88   :  { %508 = vmatmul.f32.gmra.mxu1 %v2033_v36 }
  0x8c   :  { %v2061_v15 = vpop.f32.mrf.mxu0 }
  0x8d   :  { %v2063_v62 = vpop.f32.mrf.mxu1 }
  0x8e   :  { %596 = vmatmul.f32.vlgmr.msrb.gmra.mxu2 %v1650_v20  ;;  %775 = vmatmul.f32.vlgmr.msrb.gmra.mxu3 %v2481_v24  ;;  %v2483_v20 = vand.u32 4294901760, %v1655_v23 }
  0x8f   :  { %985 = vmatmul.f32.vlgmr.msrb.gmra.mxu0 %v1635_v13 }
  0x90   :  { %1131 = vmatmul.f32.vlgmr.msrb.gmra.mxu1 %v1635_v13 }
  0x91   :  { %v303_v44 = vpop.f32.mrf.mxu2  ;;  %v513_v61 = vpop.f32.mrf.mxu3 }
  0x92   :  { %v304_v26 = vadd.f32 %v2071_v28, %v303_v44 }
  0x94   :  { %v2076_v58 = vadd.f32 %v513_v61, %v304_v26  ;;  %v2078_v21 = vpop.f32.mrf.mxu0 }
  0x95   :  { %v2080_v30 = vpop.f32.mrf.mxu1 }
  0x96   :  { %2482 = vst [vmem:[#allocation20_spill] sm:$0xff] %v2076_v58  ;;  %601 = vmatmul.f32.gmra.mxu2 %v1655_v23  ;;  %781 = vmatmul.f32.gmra.mxu3 %v2483_v20  ;;  %v2485_v58 = vand.u32 4294901760, %v1689_v42 }
  0x97   :  { %989 = vmatmul.f32.gmra.mxu0 %v1647_v18 }
  0x98   :  { %1135 = vmatmul.f32.gmra.mxu1 %v1647_v18 }
  0x99   :  { %v311_v13 = vpop.f32.mrf.mxu2  ;;  %v517_v24 = vpop.f32.mrf.mxu3 }
  0x9a   :  { %v312_v1 = vadd.f32 %v2071_v28, %v311_v13 }
  0x9c   :  { %v2088_v44 = vadd.f32 %v517_v24, %v312_v1  ;;  %v2090_v61 = vpop.f32.mrf.mxu0 }
  0x9d   :  { %v2092_v26 = vpop.f32.mrf.mxu1 }
  0x9e   :  { %2484 = vst [vmem:[#allocation21_spill] sm:$0xff] %v2088_v44  ;;  %606 = vmatmul.f32.gmra.mxu2 %v1689_v42  ;;  %787 = vmatmul.f32.gmra.mxu3 %v2485_v58  ;;  %v2487_v44 = vand.u32 4294901760, %v1717_v56 }
  0x9f   :  { %993 = vmatmul.f32.gmra.mxu0 %v1669_v33 }
  0xa0   :  { %1139 = vmatmul.f32.gmra.mxu1 %v1669_v33 }
  0xa1   :  { %v319_v18 = vpop.f32.mrf.mxu2  ;;  %v521_v23 = vpop.f32.mrf.mxu3 }
  0xa2   :  { %v320_v20 = vadd.f32 %v2071_v28, %v319_v18 }
  0xa4   :  { %v2100_v13 = vadd.f32 %v521_v23, %v320_v20  ;;  %v2102_v1 = vpop.f32.mrf.mxu0 }
  0xa5   :  { %v2104_v24 = vpop.f32.mrf.mxu1 }
  0xa6   :  { %2486 = vst [vmem:[#allocation22_spill] sm:$0xff] %v2100_v13  ;;  %611 = vmatmul.f32.gmra.mxu2 %v1717_v56  ;;  %793 = vmatmul.f32.gmra.mxu3 %v2487_v44  ;;  %v2489_v13 = vand.u32 4294901760, %v1745_v6 }
  0xa7   :  { %997 = vmatmul.f32.gmra.mxu0 %v1697_v49 }
  0xa8   :  { %1143 = vmatmul.f32.gmra.mxu1 %v1697_v49 }
  0xa9   :  { %v327_v33 = vpop.f32.mrf.mxu2  ;;  %v525_v42 = vpop.f32.mrf.mxu3 }
  0xaa   :  { %v328_v58 = vadd.f32 %v2071_v28, %v327_v33 }
  0xac   :  { %v2112_v18 = vadd.f32 %v525_v42, %v328_v58  ;;  %v2114_v23 = vpop.f32.mrf.mxu0 }
  0xad   :  { %v2116_v20 = vpop.f32.mrf.mxu1 }
  0xae   :  { %2488 = vst [vmem:[#allocation23_spill] sm:$0xff] %v2112_v18  ;;  %616 = vmatmul.f32.gmra.mxu2 %v1745_v6  ;;  %799 = vmatmul.f32.gmra.mxu3 %v2489_v13  ;;  %v2491_v18 = vand.u32 4294901760, %v1773_v34 }
  0xaf   :  { %1001 = vmatmul.f32.gmra.mxu0 %v1725_v63 }
  0xb0   :  { %1147 = vmatmul.f32.gmra.mxu1 %v1725_v63 }
  0xb1   :  { %v335_v49 = vpop.f32.mrf.mxu2  ;;  %v529_v56 = vpop.f32.mrf.mxu3 }
  0xb2   :  { %v336_v44 = vadd.f32 %v2071_v28, %v335_v49 }
  0xb4   :  { %v2124_v33 = vadd.f32 %v529_v56, %v336_v44  ;;  %v2126_v42 = vpop.f32.mrf.mxu0 }
  0xb5   :  { %v2128_v58 = vpop.f32.mrf.mxu1 }
  0xb6   :  { %2490 = vst [vmem:[#allocation24_spill] sm:$0xff] %v2124_v33  ;;  %621 = vmatmul.f32.gmra.mxu2 %v1773_v34  ;;  %805 = vmatmul.f32.gmra.mxu3 %v2491_v18  ;;  %v2493_v33 = vand.u32 4294901760, %v1801_v55 }
  0xb7   :  { %1005 = vmatmul.f32.gmra.mxu0 %v1753_v19 }
  0xb8   :  { %1151 = vmatmul.f32.gmra.mxu1 %v1753_v19 }
  0xb9   :  { %v343_v63 = vpop.f32.mrf.mxu2  ;;  %v533_v6 = vpop.f32.mrf.mxu3 }
  0xba   :  { %v344_v13 = vadd.f32 %v2071_v28, %v343_v63 }
  0xbc   :  { %v2136_v49 = vadd.f32 %v533_v6, %v344_v13  ;;  %v2138_v56 = vpop.f32.mrf.mxu0 }
  0xbd   :  { %v2140_v44 = vpop.f32.mrf.mxu1 }
  0xbe   :  { %2492 = vst [vmem:[#allocation25_spill] sm:$0xff] %v2136_v49  ;;  %626 = vmatmul.f32.gmra.mxu2 %v1801_v55  ;;  %811 = vmatmul.f32.gmra.mxu3 %v2493_v33  ;;  %v2495_v49 = vand.u32 4294901760, %v1829_v25 }
  0xbf   :  { %1009 = vmatmul.f32.gmra.mxu0 %v1781_v43 }
  0xc0   :  { %1155 = vmatmul.f32.gmra.mxu1 %v1781_v43 }
  0xc1   :  { %v351_v19 = vpop.f32.mrf.mxu2  ;;  %v537_v34 = vpop.f32.mrf.mxu3 }
  0xc2   :  { %v352_v18 = vadd.f32 %v2071_v28, %v351_v19 }
  0xc4   :  { %v2148_v63 = vadd.f32 %v537_v34, %v352_v18  ;;  %v2150_v6 = vpop.f32.mrf.mxu0 }
  0xc5   :  { %v2152_v13 = vpop.f32.mrf.mxu1 }
  0xc6   :  { %2494 = vst [vmem:[#allocation26_spill] sm:$0xff] %v2148_v63  ;;  %631 = vmatmul.f32.gmra.mxu2 %v1829_v25  ;;  %817 = vmatmul.f32.gmra.mxu3 %v2495_v49  ;;  %v2497_v63 = vand.u32 4294901760, %v1857_v5 }
  0xc7   :  { %1013 = vmatmul.f32.gmra.mxu0 %v1809_v4 }
  0xc8   :  { %1159 = vmatmul.f32.gmra.mxu1 %v1809_v4 }
  0xc9   :  { %v359_v43 = vpop.f32.mrf.mxu2  ;;  %v541_v55 = vpop.f32.mrf.mxu3 }
  0xca   :  { %v360_v33 = vadd.f32 %v2071_v28, %v359_v43 }
  0xcc   :  { %v2160_v19 = vadd.f32 %v541_v55, %v360_v33  ;;  %v2162_v34 = vpop.f32.mrf.mxu0 }
  0xcd   :  { %v2164_v18 = vpop.f32.mrf.mxu1 }
  0xce   :  { %2496 = vst [vmem:[#allocation27_spill] sm:$0xff] %v2160_v19  ;;  %636 = vmatmul.f32.gmra.mxu2 %v1857_v5  ;;  %823 = vmatmul.f32.gmra.mxu3 %v2497_v63  ;;  %v2499_v19 = vand.u32 4294901760, %v1885_v37 }
  0xcf   :  { %1017 = vmatmul.f32.gmra.mxu0 %v1837_v47 }
  0xd0   :  { %1163 = vmatmul.f32.gmra.mxu1 %v1837_v47 }
  0xd1   :  { %v367_v4 = vpop.f32.mrf.mxu2  ;;  %v545_v25 = vpop.f32.mrf.mxu3 }
  0xd2   :  { %v368_v49 = vadd.f32 %v2071_v28, %v367_v4 }
  0xd4   :  { %v2172_v43 = vadd.f32 %v545_v25, %v368_v49  ;;  %v2174_v55 = vpop.f32.mrf.mxu0 }
  0xd5   :  { %v2176_v33 = vpop.f32.mrf.mxu1 }
  0xd6   :  { %2498 = vst [vmem:[#allocation28_spill] sm:$0xff] %v2172_v43  ;;  %641 = vmatmul.f32.gmra.mxu2 %v1885_v37  ;;  %829 = vmatmul.f32.gmra.mxu3 %v2499_v19  ;;  %v2501_v43 = vand.u32 4294901760, %v1913_v22 }
  0xd7   :  { %1021 = vmatmul.f32.gmra.mxu0 %v1865_v35 }
  0xd8   :  { %1167 = vmatmul.f32.gmra.mxu1 %v1865_v35 }
  0xd9   :  { %v375_v47 = vpop.f32.mrf.mxu2  ;;  %v549_v5 = vpop.f32.mrf.mxu3 }
  0xda   :  { %v376_v63 = vadd.f32 %v2071_v28, %v375_v47 }
  0xdc   :  { %v2184_v4 = vadd.f32 %v549_v5, %v376_v63  ;;  %v2186_v25 = vpop.f32.mrf.mxu0 }
  0xdd   :  { %v2188_v49 = vpop.f32.mrf.mxu1 }
  0xde   :  { %2500 = vst [vmem:[#allocation29_spill] sm:$0xff] %v2184_v4  ;;  %646 = vmatmul.f32.gmra.mxu2 %v1913_v22  ;;  %835 = vmatmul.f32.gmra.mxu3 %v2501_v43  ;;  %v2503_v4 = vand.u32 4294901760, %v1941_v41 }
  0xdf   :  { %1025 = vmatmul.f32.gmra.mxu0 %v1893_v45 }
  0xe0   :  { %1171 = vmatmul.f32.gmra.mxu1 %v1893_v45 }
  0xe1   :  { %v383_v37 = vpop.f32.mrf.mxu2  ;;  %v553_v35 = vpop.f32.mrf.mxu3 }
  0xe2   :  { %v384_v19 = vadd.f32 %v2071_v28, %v383_v37 }
  0xe4   :  { %v2196_v47 = vadd.f32 %v553_v35, %v384_v19  ;;  %v2198_v5 = vpop.f32.mrf.mxu0 }
  0xe5   :  { %v2200_v63 = vpop.f32.mrf.mxu1 }
  0xe6   :  { %2502 = vst [vmem:[#allocation30_spill] sm:$0xff] %v2196_v47  ;;  %651 = vmatmul.f32.gmra.mxu2 %v1941_v41  ;;  %841 = vmatmul.f32.gmra.mxu3 %v2503_v4  ;;  %v2505_v47 = vand.u32 4294901760, %v1969_v32 }
  0xe7   :  { %1029 = vmatmul.f32.gmra.mxu0 %v1921_v2 }
  0xe8   :  { %1175 = vmatmul.f32.gmra.mxu1 %v1921_v2 }
  0xe9   :  { %v391_v22 = vpop.f32.mrf.mxu2  ;;  %v557_v45 = vpop.f32.mrf.mxu3 }
  0xea   :  { %v392_v43 = vadd.f32 %v2071_v28, %v391_v22 }
  0xec   :  { %v2208_v37 = vadd.f32 %v557_v45, %v392_v43  ;;  %v2210_v35 = vpop.f32.mrf.mxu0 }
  0xed   :  { %v2212_v19 = vpop.f32.mrf.mxu1 }
  0xee   :  { %2504 = vst [vmem:[#allocation31_spill] sm:$0xff] %v2208_v37  ;;  %656 = vmatmul.f32.gmra.mxu2 %v1969_v32  ;;  %847 = vmatmul.f32.gmra.mxu3 %v2505_v47  ;;  %v2507_v37 = vand.u32 4294901760, %v1997_v52 }
  0xef   :  { %1033 = vmatmul.f32.gmra.mxu0 %v1949_v48 }
  0xf0   :  { %1179 = vmatmul.f32.gmra.mxu1 %v1949_v48 }
  0xf1   :  { %v399_v41 = vpop.f32.mrf.mxu2  ;;  %v561_v2 = vpop.f32.mrf.mxu3 }
  0xf2   :  { %v400_v4 = vadd.f32 %v2071_v28, %v399_v41 }
  0xf4   :  { %v2220_v22 = vadd.f32 %v561_v2, %v400_v4  ;;  %v2222_v45 = vpop.f32.mrf.mxu0 }
  0xf5   :  { %v2224_v43 = vpop.f32.mrf.mxu1 }
  0xf6   :  { %2506 = vst [vmem:[#allocation32_spill] sm:$0xff] %v2220_v22  ;;  %661 = vmatmul.f32.gmra.mxu2 %v1997_v52  ;;  %853 = vmatmul.f32.gmra.mxu3 %v2507_v37  ;;  %v2509_v22 = vand.u32 4294901760, %v2025_v54 }
  0xf7   :  { %1037 = vmatmul.f32.gmra.mxu0 %v1977_v59 }
  0xf8   :  { %1183 = vmatmul.f32.gmra.mxu1 %v1977_v59 }
  0xf9   :  { %v407_v32 = vpop.f32.mrf.mxu2  ;;  %v565_v48 = vpop.f32.mrf.mxu3 }
  0xfa   :  { %v408_v47 = vadd.f32 %v2071_v28, %v407_v32 }
  0xfc   :  { %v2232_v41 = vadd.f32 %v565_v48, %v408_v47  ;;  %v2234_v2 = vpop.f32.mrf.mxu0 }
  0xfd   :  { %v2236_v4 = vpop.f32.mrf.mxu1 }
  0xfe   :  { %2508 = vst [vmem:[#allocation33_spill] sm:$0xff] %v2232_v41  ;;  %666 = vmatmul.f32.gmra.mxu2 %v2025_v54  ;;  %859 = vmatmul.f32.gmra.mxu3 %v2509_v22  ;;  %v2512_v41 = vand.u32 4294901760, %v2046_v40 }
  0xff   :  { %1041 = vmatmul.f32.gmra.mxu0 %v2005_v31 }
 0x100   :  { %1187 = vmatmul.f32.gmra.mxu1 %v2005_v31 }
 0x101   :  { %v415_v59 = vpop.f32.mrf.mxu2  ;;  %v569_v52 = vpop.f32.mrf.mxu3 }
 0x102   :  { %v416_v37 = vadd.f32 %v2071_v28, %v415_v59  ;;  %v176_v59 = vadd.f32 %v2071_v28, %v2061_v15  ;;  %v184_v15 = vadd.f32 %v2071_v28, %v2078_v21 }
 0x104   :  { %v2244_v32 = vadd.f32 %v569_v52, %v416_v37  ;;  %v2246_v48 = vpop.f32.mrf.mxu0 }
 0x105   :  { %v2248_v47 = vpop.f32.mrf.mxu1 }
 0x106   :  { %2510 = vst [vmem:[#allocation34_spill] sm:$0xff] %v2244_v32  ;;  %671 = vmatmul.f32.gmra.mxu2 %v2046_v40  ;;  %865 = vmatmul.f32.gmra.mxu3 %v2512_v41  ;;  %v2514_v40 = vand.u32 4294901760, %v1642_v16 }
 0x107   :  { %2511 = vst [vmem:[#allocation35_spill] sm:$0xff] %v2248_v47  ;;  %1045 = vmatmul.f32.gmra.mxu0 %v2033_v36 }
 0x108   :  { %1191 = vmatmul.f32.gmra.mxu1 %v2033_v36  ;;  %v450_v36 = vadd.f32 %v2063_v62, %v176_v59  ;;  %v454_v62 = vadd.f32 %v2080_v30, %v184_v15 }
 0x109   :  { %v423_v31 = vpop.f32.mrf.mxu2  ;;  %v573_v54 = vpop.f32.mrf.mxu3 }
 0x10a   :  { %v424_v22 = vadd.f32 %v2071_v28, %v423_v31 }
 0x10c   :  { %v2258_v52 = vadd.f32 %v573_v54, %v424_v22  ;;  %v986_v37 = vpop.f32.mrf.mxu0 }
 0x10d   :  { %v1132_v32 = vpop.f32.mrf.mxu1 }
 0x10e   :  { %2513 = vst [vmem:[#allocation36_spill] sm:$0xff] %v2258_v52  ;;  %676 = vmatmul.f32.gmra.mxu2 %v1642_v16  ;;  %871 = vmatmul.f32.gmra.mxu3 %v2514_v40  ;;  %v2515_v16 = vand.u32 4294901760, %v1645_v17 }
 0x10f   :  { %1049 = vmatmul.f32.gmra.mxu0 %v1627_v8 }
 0x110   :  { %1195 = vmatmul.f32.gmra.mxu1 %v1627_v8 }
 0x111   :  { %v597_v41 = vpop.f32.mrf.mxu2  ;;  %v776_v31 = vpop.f32.mrf.mxu3 }
 0x112   :  { %v598_v47 = vadd.f32 %v597_v41, %v450_v36 }
 0x114   :  { %v777_v54 = vadd.f32 %v776_v31, %v598_v47  ;;  %v990_v22 = vpop.f32.mrf.mxu0  ;;  %v192_v47 = vadd.f32 %v2071_v28, %v2090_v61 }
 0x115   :  { %v1136_v52 = vpop.f32.mrf.mxu1 }
 0x116   :  { %v987_v10 = vadd.f32 %v986_v37, %v777_v54  ;;  %681 = vmatmul.f32.gmra.mxu2 %v1645_v17  ;;  %877 = vmatmul.f32.gmra.mxu3 %v2515_v16  ;;  %v2516_v17 = vand.u32 4294901760, %v1682_v39 }
 0x117   :  { %1053 = vmatmul.f32.gmra.mxu0 %v1629_v9 }
 0x118   :  { %v1133_v8 = vadd.f32 %v1132_v32, %v987_v10  ;;  %1199 = vmatmul.f32.gmra.mxu1 %v1629_v9  ;;  %v458_v9 = vadd.f32 %v2092_v26, %v192_v47  ;;  %v2517_v26 = vand.u32 4294901760, %v1710_v53  ;;  %v208_v47 = vadd.f32 %v2071_v28, %v2114_v23 }
 0x119   :  { %v602_v59 = vpop.f32.mrf.mxu2  ;;  %v782_v40 = vpop.f32.mrf.mxu3 }
 0x11a   :  { %1259 = vst [vmem:[#allocation2] sm:$0xff] %v1133_v8  ;;  %v603_v21 = vadd.f32 %v602_v59, %v454_v62  ;;  %v1291_v15 = vmax.f32 %v1133_v8, 0.0 }
 0x11c   :  { %v783_v37 = vadd.f32 %v782_v40, %v603_v21  ;;  %v994_v36 = vpop.f32.mrf.mxu0 }
 0x11d   :  { %v1140_v41 = vpop.f32.mrf.mxu1 }
 0x11e   :  { %v991_v31 = vadd.f32 %v990_v22, %v783_v37  ;;  %686 = vmatmul.f32.gmra.mxu2 %v1682_v39  ;;  %883 = vmatmul.f32.gmra.mxu3 %v2516_v17  ;;  %v200_v22 = vadd.f32 %v2071_v28, %v2102_v1 }
 0x11f   :  { %1057 = vmatmul.f32.gmra.mxu0 %v1663_v29 }
 0x120   :  { %v1137_v30 = vadd.f32 %v1136_v52, %v991_v31  ;;  %1203 = vmatmul.f32.gmra.mxu1 %v1663_v29  ;;  %v462_v29 = vadd.f32 %v2104_v24, %v200_v22 }
 0x121   :  { %v607_v10 = vpop.f32.mrf.mxu2  ;;  %v788_v32 = vpop.f32.mrf.mxu3 }
 0x122   :  { %1260 = vst [vmem:[#allocation2 + $0x8] sm:$0xff] %v1137_v30  ;;  %v1292_v61 = vmax.f32 %v1137_v30, 0.0  ;;  %v608_v54 = vadd.f32 %v607_v10, %v458_v9 }
 0x124   :  { %v1426_v16 = vpack.c.bf16 %v1292_v61, %v1291_v15  ;;  %v789_v62 = vadd.f32 %v788_v32, %v608_v54  ;;  %v998_v39 = vpop.f32.mrf.mxu0  ;;  %v216_v32 = vadd.f32 %v2071_v28, %v2126_v42 }
 0x125   :  { %v1144_v59 = vpop.f32.mrf.mxu1 }
 0x126   :  { %1427 = vst [vmem:[#allocation4] sm:$0xff] %v1426_v16   ;;  %v995_v40 = vadd.f32 %v994_v36, %v789_v62  ;;  %691 = vmatmul.f32.gmra.mxu2 %v1710_v53  ;;  %889 = vmatmul.f32.gmra.mxu3 %v2517_v26  ;;  %v2518_v53 = vand.u32 4294901760, %v1738_v3 }
 0x127   :  { %1061 = vmatmul.f32.gmra.mxu0 %v1694_v46 }
 0x128   :  { %v1141_v52 = vadd.f32 %v1140_v41, %v995_v40  ;;  %1207 = vmatmul.f32.gmra.mxu1 %v1694_v46  ;;  %v466_v46 = vadd.f32 %v2116_v20, %v208_v47  ;;  %v2519_v20 = vand.u32 4294901760, %v1766_v27 }
 0x129   :  { %v612_v8 = vpop.f32.mrf.mxu2  ;;  %v794_v1 = vpop.f32.mrf.mxu3 }
 0x12a   :  { %1261 = vst [vmem:[#allocation2 + $0x10] sm:$0xff] %v1141_v52  ;;  %v613_v21 = vadd.f32 %v612_v8, %v462_v29  ;;  %v1293_v30 = vmax.f32 %v1141_v52, 0.0 }
 0x12c   :  { %v795_v37 = vadd.f32 %v794_v1, %v613_v21  ;;  %v1002_v36 = vpop.f32.mrf.mxu0 }
 0x12d   :  { %v1148_v31 = vpop.f32.mrf.mxu1 }
 0x12e   :  { %v999_v17 = vadd.f32 %v998_v39, %v795_v37  ;;  %696 = vmatmul.f32.gmra.mxu2 %v1738_v3  ;;  %895 = vmatmul.f32.gmra.mxu3 %v2518_v53  ;;  %v232_v37 = vadd.f32 %v2071_v28, %v2150_v6 }
 0x12f   :  { %1065 = vmatmul.f32.gmra.mxu0 %v1722_v60 }
 0x130   :  { %v1145_v24 = vadd.f32 %v1144_v59, %v999_v17  ;;  %1211 = vmatmul.f32.gmra.mxu1 %v1722_v60  ;;  %v470_v60 = vadd.f32 %v2128_v58, %v216_v32  ;;  %v224_v59 = vadd.f32 %v2071_v28, %v2138_v56 }
 0x131   :  { %v617_v41 = vpop.f32.mrf.mxu2  ;;  %v800_v9 = vpop.f32.mrf.mxu3 }
 0x132   :  { %1262 = vst [vmem:[#allocation2 + $0x18] sm:$0xff] %v1145_v24  ;;  %v1294_v23 = vmax.f32 %v1145_v24, 0.0  ;;  %v618_v10 = vadd.f32 %v617_v41, %v466_v46 }
 0x134   :  { %v1431_v15 = vpack.c.bf16 %v1294_v23, %v1293_v30  ;;  %v801_v61 = vadd.f32 %v800_v9, %v618_v10  ;;  %v1006_v3 = vpop.f32.mrf.mxu0  ;;  %v240_v9 = vadd.f32 %v2071_v28, %v2162_v34 }
 0x135   :  { %v1152_v54 = vpop.f32.mrf.mxu1 }
 0x136   :  { %1503 = vst [vmem:[#allocation4 + $0x8] sm:$0xff] %v1431_v15   ;;  %v1003_v22 = vadd.f32 %v1002_v36, %v801_v61  ;;  %701 = vmatmul.f32.gmra.mxu2 %v1766_v27  ;;  %901 = vmatmul.f32.gmra.mxu3 %v2519_v20  ;;  %v2520_v27 = vand.u32 4294901760, %v1794_v51  ;;  %v248_v20 = vadd.f32 %v2071_v28, %v2174_v55 }
 0x137   :  { %1069 = vmatmul.f32.gmra.mxu0 %v1750_v12 }
 0x138   :  { %v1149_v16 = vadd.f32 %v1148_v31, %v1003_v22  ;;  %1215 = vmatmul.f32.gmra.mxu1 %v1750_v12  ;;  %v474_v12 = vadd.f32 %v2140_v44, %v224_v59  ;;  %v2521_v44 = vand.u32 4294901760, %v1822_v14  ;;  %v2526_v59 = vld [vmem:[#allocation9_spill] sm:$0xff] }
 0x139   :  { %v622_v62 = vpop.f32.mrf.mxu2  ;;  %v806_v42 = vpop.f32.mrf.mxu3 }
 0x13a   :  { %1263 = vst [vmem:[#allocation2 + $0x20] sm:$0xff] %v1149_v16  ;;  %v623_v39 = vadd.f32 %v622_v62, %v470_v60  ;;  %v1295_v21 = vmax.f32 %v1149_v16, 0.0 }
 0x13c   :  { %v807_v40 = vadd.f32 %v806_v42, %v623_v39  ;;  %v1010_v26 = vpop.f32.mrf.mxu0  ;;  %v2524_v39 = vld [vmem:[#allocation10_spill] sm:$0xff] }
 0x13d   :  { %v1156_v29 = vpop.f32.mrf.mxu1 }
 0x13e   :  { %v1007_v52 = vadd.f32 %v1006_v3, %v807_v40  ;;  %706 = vmatmul.f32.gmra.mxu2 %v1794_v51  ;;  %907 = vmatmul.f32.gmra.mxu3 %v2520_v27  ;;  %v486_v40 = vadd.f32 %v2176_v33, %v248_v20  ;;  %v256_v27 = vadd.f32 %v2071_v28, %v2186_v25  ;;  %v2529_v33 = vld [vmem:[#allocation11_spill] sm:$0xff] }
 0x13f   :  { %1073 = vmatmul.f32.gmra.mxu0 %v1778_v38 }
 0x140   :  { %v1153_v58 = vadd.f32 %v1152_v54, %v1007_v52  ;;  %1219 = vmatmul.f32.gmra.mxu1 %v1778_v38  ;;  %v478_v38 = vadd.f32 %v2152_v13, %v232_v37  ;;  %v2523_v13 = vld [vmem:[#allocation8_spill] sm:$0xff] }
 0x141   :  { %v627_v8 = vpop.f32.mrf.mxu2  ;;  %v812_v1 = vpop.f32.mrf.mxu3 }
 0x142   :  { %1264 = vst [vmem:[#allocation2 + $0x28] sm:$0xff] %v1153_v58  ;;  %v1296_v56 = vmax.f32 %v1153_v58, 0.0  ;;  %v628_v47 = vadd.f32 %v627_v8, %v474_v12 }
 0x144   :  { %v1436_v36 = vpack.c.bf16 %v1296_v56, %v1295_v21  ;;  %v813_v31 = vadd.f32 %v812_v1, %v628_v47  ;;  %v1014_v51 = vpop.f32.mrf.mxu0  ;;  %v2527_v21 = vld [vmem:[#allocation12_spill] sm:$0xff]  ;;  %v490_v47 = vadd.f32 %v2188_v49, %v256_v27 }
 0x145   :  { %v1160_v17 = vpop.f32.mrf.mxu1  ;;  %v2528_v56 = vand.u32 4294901760, %v2527_v21 }
 0x146   :  { %1504 = vst [vmem:[#allocation4 + $0x10] sm:$0xff] %v1436_v36   ;;  %v1011_v53 = vadd.f32 %v1010_v26, %v813_v31  ;;  %711 = vmatmul.f32.gmra.mxu2 %v1822_v14  ;;  %913 = vmatmul.f32.gmra.mxu3 %v2521_v44  ;;  %v2522_v14 = vand.u32 4294901760, %v1850_v57 }
 0x147   :  { %1077 = vmatmul.f32.gmra.mxu0 %v1806_v0 }
 0x148   :  { %v1157_v46 = vadd.f32 %v1156_v29, %v1011_v53  ;;  %1223 = vmatmul.f32.gmra.mxu1 %v1806_v0  ;;  %v482_v0 = vadd.f32 %v2164_v18, %v240_v9  ;;  %v2525_v18 = vand.u32 4294901760, %v2524_v39  ;;  %v264_v53 = vadd.f32 %v2071_v28, %v2198_v5  ;;  %v2532_v9 = vld [vmem:[#allocation13_spill] sm:$0xff] }
 0x149   :  { %v632_v24 = vpop.f32.mrf.mxu2  ;;  %v818_v6 = vpop.f32.mrf.mxu3 }
 0x14a   :  { %1265 = vst [vmem:[#allocation2 + $0x30] sm:$0xff] %v1157_v46  ;;  %v633_v41 = vadd.f32 %v632_v24, %v478_v38  ;;  %v1297_v54 = vmax.f32 %v1157_v46, 0.0 }
 0x14c   :  { %v819_v30 = vadd.f32 %v818_v6, %v633_v41  ;;  %v1018_v23 = vpop.f32.mrf.mxu0  ;;  %v2530_v41 = vld [vmem:[#allocation14_spill] sm:$0xff] }
 0x14d   :  { %v1164_v10 = vpop.f32.mrf.mxu1  ;;  %v2531_v49 = vand.u32 4294901760, %v2530_v41 }
 0x14e   :  { %v1015_v32 = vadd.f32 %v1014_v51, %v819_v30  ;;  %716 = vmatmul.f32.gmra.mxu2 %v1850_v57  ;;  %919 = vmatmul.f32.gmra.mxu3 %v2522_v14  ;;  %v494_v30 = vadd.f32 %v2200_v63, %v264_v53  ;;  %v272_v14 = vadd.f32 %v2071_v28, %v2210_v35  ;;  %v2535_v63 = vld [vmem:[#allocation15_spill] sm:$0xff] }
 0x14f   :  { %1081 = vmatmul.f32.gmra.mxu0 %v2523_v13 }
 0x150   :  { %v1161_v15 = vadd.f32 %v1160_v17, %v1015_v32  ;;  %1227 = vmatmul.f32.gmra.mxu1 %v2523_v13 }
 0x151   :  { %v637_v61 = vpop.f32.mrf.mxu2  ;;  %v824_v3 = vpop.f32.mrf.mxu3 }
 0x152   :  { %1266 = vst [vmem:[#allocation2 + $0x38] sm:$0xff] %v1161_v15  ;;  %v1298_v34 = vmax.f32 %v1161_v15, 0.0  ;;  %v638_v22 = vadd.f32 %v637_v61, %v482_v0 }
 0x154   :  { %v1441_v60 = vpack.c.bf16 %v1298_v34, %v1297_v54  ;;  %v825_v16 = vadd.f32 %v824_v3, %v638_v22  ;;  %v1022_v57 = vpop.f32.mrf.mxu0  ;;  %v2533_v3 = vld [vmem:[#allocation16_spill] sm:$0xff]  ;;  %v498_v34 = vadd.f32 %v2212_v19, %v272_v14 }
 0x155   :  { %v1168_v62 = vpop.f32.mrf.mxu1  ;;  %v2534_v54 = vand.u32 4294901760, %v2533_v3 }
 0x156   :  { %1505 = vst [vmem:[#allocation4 + $0x18] sm:$0xff] %v1441_v60   ;;  %v1019_v42 = vadd.f32 %v1018_v23, %v825_v16  ;;  %721 = vmatmul.f32.gmra.mxu2 %v2524_v39  ;;  %925 = vmatmul.f32.gmra.mxu3 %v2525_v18 }
 0x157   :  { %1085 = vmatmul.f32.gmra.mxu0 %v2526_v59 }
 0x158   :  { %v1165_v26 = vadd.f32 %v1164_v10, %v1019_v42  ;;  %1231 = vmatmul.f32.gmra.mxu1 %v2526_v59 }
 0x159   :  { %v642_v29 = vpop.f32.mrf.mxu2  ;;  %v830_v55 = vpop.f32.mrf.mxu3 }
 0x15a   :  { %1267 = vst [vmem:[#allocation2 + $0x40] sm:$0xff] %v1165_v26  ;;  %v643_v52 = vadd.f32 %v642_v29, %v486_v40  ;;  %v1299_v51 = vmax.f32 %v1165_v26, 0.0  ;;  %v2536_v26 = vld [vmem:[#allocation18_spill] sm:$0xff]  ;;  %v2538_v29 = vld [vmem:[#allocation17_spill] sm:$0xff] }
 0x15b   :  { %v2537_v19 = vand.u32 4294901760, %v2536_v26 }
 0x15c   :  { %v831_v12 = vadd.f32 %v830_v55, %v643_v52  ;;  %v1026_v58 = vpop.f32.mrf.mxu0 }
 0x15d   :  { %v1172_v8 = vpop.f32.mrf.mxu1 }
 0x15e   :  { %v1023_v1 = vadd.f32 %v1022_v57, %v831_v12  ;;  %726 = vmatmul.f32.gmra.mxu2 %v2527_v21  ;;  %931 = vmatmul.f32.gmra.mxu3 %v2528_v56 }
 0x15f   :  { %1089 = vmatmul.f32.gmra.mxu0 %v2529_v33 }
 0x160   :  { %v1169_v37 = vadd.f32 %v1168_v62, %v1023_v1  ;;  %1235 = vmatmul.f32.gmra.mxu1 %v2529_v33  ;;  %v280_v62 = vadd.f32 %v2071_v28, %v2222_v45  ;;  %v2539_v33 = vand.u32 4294901760, %v2018_v11 }
 0x161   :  { %v647_v36 = vpop.f32.mrf.mxu2  ;;  %v836_v31 = vpop.f32.mrf.mxu3 }
 0x162   :  { %1268 = vst [vmem:[#allocation2 + $0x48] sm:$0xff] %v1169_v37  ;;  %v1300_v25 = vmax.f32 %v1169_v37, 0.0  ;;  %v648_v17 = vadd.f32 %v647_v36, %v490_v47  ;;  %v502_v55 = vadd.f32 %v2224_v43, %v280_v62 }
 0x164   :  { %v1446_v44 = vpack.c.bf16 %v1300_v25, %v1299_v51  ;;  %v837_v38 = vadd.f32 %v836_v31, %v648_v17  ;;  %v1030_v46 = vpop.f32.mrf.mxu0  ;;  %v296_v25 = vadd.f32 %v2071_v28, %v2246_v48 }
 0x165   :  { %v1176_v24 = vpop.f32.mrf.mxu1 }
 0x166   :  { %1506 = vst [vmem:[#allocation4 + $0x20] sm:$0xff] %v1446_v44   ;;  %v1027_v6 = vadd.f32 %v1026_v58, %v837_v38  ;;  %731 = vmatmul.f32.gmra.mxu2 %v2530_v41  ;;  %937 = vmatmul.f32.gmra.mxu3 %v2531_v49  ;;  %v288_v58 = vadd.f32 %v2071_v28, %v2234_v2 }
 0x167   :  { %1093 = vmatmul.f32.gmra.mxu0 %v2532_v9 }
 0x168   :  { %v1173_v23 = vadd.f32 %v1172_v8, %v1027_v6  ;;  %1239 = vmatmul.f32.gmra.mxu1 %v2532_v9  ;;  %v506_v43 = vadd.f32 %v2236_v4, %v288_v58  ;;  %v2540_v4 = vand.u32 4294901760, %v2040_v50 }
 0x169   :  { %v652_v10 = vpop.f32.mrf.mxu2  ;;  %v842_v5 = vpop.f32.mrf.mxu3 }
 0x16a   :  { %1269 = vst [vmem:[#allocation2 + $0x50] sm:$0xff] %v1173_v23  ;;  %v653_v32 = vadd.f32 %v652_v10, %v494_v30  ;;  %v1301_v16 = vmax.f32 %v1173_v23, 0.0 }
 0x16c   :  { %v843_v13 = vadd.f32 %v842_v5, %v653_v32  ;;  %v1034_v0 = vpop.f32.mrf.mxu0 }
 0x16d   :  { %v1180_v15 = vpop.f32.mrf.mxu1 }
 0x16e   :  { %v1031_v61 = vadd.f32 %v1030_v46, %v843_v13  ;;  %736 = vmatmul.f32.gmra.mxu2 %v2533_v3  ;;  %943 = vmatmul.f32.gmra.mxu3 %v2534_v54  ;;  %v2542_v46 = vld [vmem:[#allocation35_spill] sm:$0xff]  ;;  %v2543_v13 = vld [vmem:[#allocation20_spill] sm:$0xff] }
 0x16f   :  { %1097 = vmatmul.f32.gmra.mxu0 %v2535_v63 }
 0x170   :  { %v1177_v22 = vadd.f32 %v1176_v24, %v1031_v61  ;;  %1243 = vmatmul.f32.gmra.mxu1 %v2535_v63  ;;  %v510_v24 = vadd.f32 %v2542_v46, %v296_v25 }
 0x171   :  { %v657_v20 = vpop.f32.mrf.mxu2  ;;  %v848_v60 = vpop.f32.mrf.mxu3 }
 0x172   :  { %1270 = vst [vmem:[#allocation2 + $0x58] sm:$0xff] %v1177_v22  ;;  %v1302_v35 = vmax.f32 %v1177_v22, 0.0  ;;  %v658_v57 = vadd.f32 %v657_v20, %v498_v34 }
 0x174   :  { %v1451_v42 = vpack.c.bf16 %v1302_v35, %v1301_v16  ;;  %v849_v39 = vadd.f32 %v848_v60, %v658_v57  ;;  %v1038_v18 = vpop.f32.mrf.mxu0  ;;  %v2544_v60 = vld [vmem:[#allocation21_spill] sm:$0xff] }
 0x175   :  { %v1184_v59 = vpop.f32.mrf.mxu1 }
 0x176   :  { %1507 = vst [vmem:[#allocation4 + $0x28] sm:$0xff] %v1451_v42   ;;  %v1035_v40 = vadd.f32 %v1034_v0, %v849_v39  ;;  %741 = vmatmul.f32.gmra.mxu2 %v2536_v26  ;;  %949 = vmatmul.f32.gmra.mxu3 %v2537_v19  ;;  %v2545_v19 = vld [vmem:[#allocation22_spill] sm:$0xff] }
 0x177   :  { %1101 = vmatmul.f32.gmra.mxu0 %v2538_v29 }
 0x178   :  { %v1181_v52 = vadd.f32 %v1180_v15, %v1035_v40  ;;  %1247 = vmatmul.f32.gmra.mxu1 %v2538_v29 }
 0x179   :  { %v662_v27 = vpop.f32.mrf.mxu2  ;;  %v854_v45 = vpop.f32.mrf.mxu3 }
 0x17a   :  { %1271 = vst [vmem:[#allocation2 + $0x60] sm:$0xff] %v1181_v52  ;;  %v663_v12 = vadd.f32 %v662_v27, %v502_v55  ;;  %v1303_v31 = vmax.f32 %v1181_v52, 0.0 }
 0x17c   :  { %v855_v8 = vadd.f32 %v854_v45, %v663_v12  ;;  %v1042_v1 = vpop.f32.mrf.mxu0 }
 0x17d   :  { %v1188_v21 = vpop.f32.mrf.mxu1 }
 0x17e   :  { %v1039_v56 = vadd.f32 %v1038_v18, %v855_v8  ;;  %746 = vmatmul.f32.gmra.mxu2 %v2018_v11  ;;  %955 = vmatmul.f32.gmra.mxu3 %v2539_v33 }
 0x17f   :  { %1105 = vmatmul.f32.gmra.mxu0 %v2002_v7 }
 0x180   :  { %v1185_v47 = vadd.f32 %v1184_v59, %v1039_v56  ;;  %1251 = vmatmul.f32.gmra.mxu1 %v2002_v7  ;;  %v2541_v7 = vld [vmem:[#allocation19_spill] sm:$0xff] }
 0x181   :  { %v667_v37 = vpop.f32.mrf.mxu2  ;;  %v860_v36 = vpop.f32.mrf.mxu3 }
 0x182   :  { %1272 = vst [vmem:[#allocation2 + $0x68] sm:$0xff] %v1185_v47  ;;  %v1304_v2 = vmax.f32 %v1185_v47, 0.0  ;;  %v668_v51 = vadd.f32 %v667_v37, %v506_v43 }
 0x184   :  { %v1456_v17 = vpack.c.bf16 %v1304_v2, %v1303_v31  ;;  %v861_v53 = vadd.f32 %v860_v36, %v668_v51  ;;  %v1046_v11 = vpop.f32.mrf.mxu0 }
 0x185   :  { %v1192_v44 = vpop.f32.mrf.mxu1 }
 0x186   :  { %1508 = vst [vmem:[#allocation4 + $0x30] sm:$0xff] %v1456_v17   ;;  %v1043_v38 = vadd.f32 %v1042_v1, %v861_v53  ;;  %751 = vmatmul.f32.gmra.mxu2 %v2040_v50  ;;  %961 = vmatmul.f32.gmra.mxu3 %v2540_v4  ;;  %v2547_v17 = vld [vmem:[#allocation24_spill] sm:$0xff] }
 0x187   :  { %1109 = vmatmul.f32.gmra.mxu0 %v2541_v7 }
 0x188   :  { %v1189_v6 = vadd.f32 %v1188_v21, %v1043_v38  ;;  %1255 = vmatmul.f32.gmra.mxu1 %v2541_v7  ;;  %v2546_v21 = vld [vmem:[#allocation23_spill] sm:$0xff] }
 0x189   :  { %v672_v41 = vpop.f32.mrf.mxu2  ;;  %v866_v28 = vpop.f32.mrf.mxu3 }
 0x18a   :  { %1273 = vst [vmem:[#allocation2 + $0x70] sm:$0xff] %v1189_v6  ;;  %v673_v48 = vadd.f32 %v672_v41, %v510_v24  ;;  %v1305_v50 = vmax.f32 %v1189_v6, 0.0  ;;  %v2548_v41 = vld [vmem:[#allocation25_spill] sm:$0xff] }
 0x18c   :  { %v867_v49 = vadd.f32 %v866_v28, %v673_v48  ;;  %v1050_v9 = vpop.f32.mrf.mxu0 }
 0x18d   :  { %v1196_v30 = vpop.f32.mrf.mxu1 }
 0x18e   :  { %v1047_v23 = vadd.f32 %v1046_v11, %v867_v49 }
 0x190   :  { %v1193_v10 = vadd.f32 %v1192_v44, %v1047_v23 }
 0x191   :  { %v677_v5 = vpop.f32.mrf.mxu2  ;;  %v872_v32 = vpop.f32.mrf.mxu3 }
 0x192   :  { %1274 = vst [vmem:[#allocation2 + $0x78] sm:$0xff] %v1193_v10  ;;  %v1306_v14 = vmax.f32 %v1193_v10, 0.0  ;;  %v678_v0 = vadd.f32 %v677_v5, %v2543_v13 }
 0x194   :  { %v1461_v15 = vpack.c.bf16 %v1306_v14, %v1305_v50  ;;  %v873_v61 = vadd.f32 %v872_v32, %v678_v0  ;;  %v1054_v3 = vpop.f32.mrf.mxu0  ;;  %v2549_v14 = vld [vmem:[#allocation26_spill] sm:$0xff] }
 0x195   :  { %v1200_v54 = vpop.f32.mrf.mxu1 }
 0x196   :  { %1509 = vst [vmem:[#allocation4 + $0x38] sm:$0xff] %v1461_v15   ;;  %v1051_v63 = vadd.f32 %v1050_v9, %v873_v61 }
 0x198   :  { %v1197_v34 = vadd.f32 %v1196_v30, %v1051_v63 }
 0x199   :  { %v682_v22 = vpop.f32.mrf.mxu2  ;;  %v878_v20 = vpop.f32.mrf.mxu3 }
 0x19a   :  { %1275 = vst [vmem:[#allocation2 + $0x80] sm:$0xff] %v1197_v34  ;;  %v683_v16 = vadd.f32 %v682_v22, %v2544_v60  ;;  %v1307_v40 = vmax.f32 %v1197_v34, 0.0 }
 0x19c   :  { %v879_v35 = vadd.f32 %v878_v20, %v683_v16  ;;  %v1058_v57 = vpop.f32.mrf.mxu0  ;;  %v2550_v20 = vld [vmem:[#allocation27_spill] sm:$0xff] }
 0x19d   :  { %v1204_v62 = vpop.f32.mrf.mxu1 }
 0x19e   :  { %v1055_v42 = vadd.f32 %v1054_v3, %v879_v35 }
 0x1a0   :  { %v1201_v39 = vadd.f32 %v1200_v54, %v1055_v42 }
 0x1a1   :  { %v687_v18 = vpop.f32.mrf.mxu2  ;;  %v884_v59 = vpop.f32.mrf.mxu3 }
 0x1a2   :  { %1276 = vst [vmem:[#allocation2 + $0x88] sm:$0xff] %v1201_v39  ;;  %v1308_v26 = vmax.f32 %v1201_v39, 0.0  ;;  %v688_v29 = vadd.f32 %v687_v18, %v2545_v19 }
 0x1a4   :  { %v1466_v55 = vpack.c.bf16 %v1308_v26, %v1307_v40  ;;  %v885_v52 = vadd.f32 %v884_v59, %v688_v29  ;;  %v1062_v27 = vpop.f32.mrf.mxu0  ;;  %v2551_v26 = vld [vmem:[#allocation28_spill] sm:$0xff] }
 0x1a5   :  { %v1208_v45 = vpop.f32.mrf.mxu1 }
 0x1a6   :  { %1510 = vst [vmem:[#allocation4 + $0x40] sm:$0xff] %v1466_v55   ;;  %v1059_v12 = vadd.f32 %v1058_v57, %v885_v52 }
 0x1a8   :  { %v1205_v58 = vadd.f32 %v1204_v62, %v1059_v12 }
 0x1a9   :  { %v692_v8 = vpop.f32.mrf.mxu2  ;;  %v890_v1 = vpop.f32.mrf.mxu3 }
 0x1aa   :  { %1277 = vst [vmem:[#allocation2 + $0x90] sm:$0xff] %v1205_v58  ;;  %v693_v56 = vadd.f32 %v692_v8, %v2546_v21  ;;  %v1309_v51 = vmax.f32 %v1205_v58, 0.0 }
 0x1ac   :  { %v891_v33 = vadd.f32 %v890_v1, %v693_v56  ;;  %v1066_v43 = vpop.f32.mrf.mxu0  ;;  %v2552_v1 = vld [vmem:[#allocation29_spill] sm:$0xff] }
 0x1ad   :  { %v1212_v47 = vpop.f32.mrf.mxu1 }
 0x1ae   :  { %v1063_v37 = vadd.f32 %v1062_v27, %v891_v33 }
 0x1b0   :  { %v1209_v36 = vadd.f32 %v1208_v45, %v1063_v37 }
 0x1b1   :  { %v697_v31 = vpop.f32.mrf.mxu2  ;;  %v896_v2 = vpop.f32.mrf.mxu3 }
 0x1b2   :  { %1278 = vst [vmem:[#allocation2 + $0x98] sm:$0xff] %v1209_v36  ;;  %v1310_v25 = vmax.f32 %v1209_v36, 0.0  ;;  %v698_v53 = vadd.f32 %v697_v31, %v2547_v17 }
 0x1b4   :  { %v1471_v11 = vpack.c.bf16 %v1310_v25, %v1309_v51  ;;  %v897_v44 = vadd.f32 %v896_v2, %v698_v53  ;;  %v1070_v38 = vpop.f32.mrf.mxu0  ;;  %v2553_v25 = vld [vmem:[#allocation30_spill] sm:$0xff] }
 0x1b5   :  { %v1216_v4 = vpop.f32.mrf.mxu1 }
 0x1b6   :  { %1511 = vst [vmem:[#allocation4 + $0x48] sm:$0xff] %v1471_v11   ;;  %v1067_v7 = vadd.f32 %v1066_v43, %v897_v44 }
 0x1b8   :  { %v1213_v46 = vadd.f32 %v1212_v47, %v1067_v7 }
 0x1b9   :  { %v702_v24 = vpop.f32.mrf.mxu2  ;;  %v902_v6 = vpop.f32.mrf.mxu3 }
 0x1ba   :  { %1279 = vst [vmem:[#allocation2 + $0xa0] sm:$0xff] %v1213_v46  ;;  %v703_v28 = vadd.f32 %v702_v24, %v2548_v41  ;;  %v1311_v32 = vmax.f32 %v1213_v46, 0.0 }
 0x1bc   :  { %v903_v48 = vadd.f32 %v902_v6, %v703_v28  ;;  %v1074_v49 = vpop.f32.mrf.mxu0  ;;  %v2554_v6 = vld [vmem:[#allocation31_spill] sm:$0xff] }
 0x1bd   :  { %v1220_v9 = vpop.f32.mrf.mxu1 }
 0x1be   :  { %v1071_v30 = vadd.f32 %v1070_v38, %v903_v48 }
 0x1c0   :  { %v1217_v23 = vadd.f32 %v1216_v4, %v1071_v30 }
 0x1c1   :  { %v707_v10 = vpop.f32.mrf.mxu2  ;;  %v908_v5 = vpop.f32.mrf.mxu3 }
 0x1c2   :  { %1280 = vst [vmem:[#allocation2 + $0xa8] sm:$0xff] %v1217_v23  ;;  %v1312_v50 = vmax.f32 %v1217_v23, 0.0  ;;  %v708_v13 = vadd.f32 %v707_v10, %v2549_v14 }
 0x1c4   :  { %v1476_v0 = vpack.c.bf16 %v1312_v50, %v1311_v32  ;;  %v909_v15 = vadd.f32 %v908_v5, %v708_v13  ;;  %v1078_v61 = vpop.f32.mrf.mxu0  ;;  %v2555_v50 = vld [vmem:[#allocation32_spill] sm:$0xff] }
 0x1c5   :  { %v1224_v3 = vpop.f32.mrf.mxu1 }
 0x1c6   :  { %1512 = vst [vmem:[#allocation4 + $0x50] sm:$0xff] %v1476_v0   ;;  %v1075_v54 = vadd.f32 %v1074_v49, %v909_v15 }
 0x1c8   :  { %v1221_v63 = vadd.f32 %v1220_v9, %v1075_v54 }
 0x1c9   :  { %v712_v34 = vpop.f32.mrf.mxu2  ;;  %v914_v22 = vpop.f32.mrf.mxu3 }
 0x1ca   :  { %1281 = vst [vmem:[#allocation2 + $0xb0] sm:$0xff] %v1221_v63  ;;  %v713_v60 = vadd.f32 %v712_v34, %v2550_v20  ;;  %v1313_v59 = vmax.f32 %v1221_v63, 0.0 }
 0x1cc   :  { %v915_v16 = vadd.f32 %v914_v22, %v713_v60  ;;  %v1082_v35 = vpop.f32.mrf.mxu0  ;;  %v2556_v22 = vld [vmem:[#allocation33_spill] sm:$0xff] }
 0x1cd   :  { %v1228_v57 = vpop.f32.mrf.mxu1 }
 0x1ce   :  { %v1079_v62 = vadd.f32 %v1078_v61, %v915_v16 }
 0x1d0   :  { %v1225_v42 = vadd.f32 %v1224_v3, %v1079_v62 }
 0x1d1   :  { %v717_v39 = vpop.f32.mrf.mxu2  ;;  %v920_v18 = vpop.f32.mrf.mxu3 }
 0x1d2   :  { %1282 = vst [vmem:[#allocation2 + $0xb8] sm:$0xff] %v1225_v42  ;;  %v1314_v40 = vmax.f32 %v1225_v42, 0.0  ;;  %v718_v19 = vadd.f32 %v717_v39, %v2551_v26 }
 0x1d4   :  { %v1481_v29 = vpack.c.bf16 %v1314_v40, %v1313_v59  ;;  %v921_v55 = vadd.f32 %v920_v18, %v718_v19  ;;  %v1086_v52 = vpop.f32.mrf.mxu0  ;;  %v2557_v59 = vld [vmem:[#allocation34_spill] sm:$0xff] }
 0x1d5   :  { %v1232_v27 = vpop.f32.mrf.mxu1 }
 0x1d6   :  { %1513 = vst [vmem:[#allocation4 + $0x58] sm:$0xff] %v1481_v29   ;;  %v1083_v45 = vadd.f32 %v1082_v35, %v921_v55 }
 0x1d8   :  { %v1229_v12 = vadd.f32 %v1228_v57, %v1083_v45 }
 0x1d9   :  { %v722_v58 = vpop.f32.mrf.mxu2  ;;  %v926_v8 = vpop.f32.mrf.mxu3 }
 0x1da   :  { %1283 = vst [vmem:[#allocation2 + $0xc0] sm:$0xff] %v1229_v12  ;;  %v723_v21 = vadd.f32 %v722_v58, %v2552_v1  ;;  %v1315_v2 = vmax.f32 %v1229_v12, 0.0  ;;  %v2558_v12 = vld [vmem:[#allocation36_spill] sm:$0xff] }
 0x1dc   :  { %v927_v56 = vadd.f32 %v926_v8, %v723_v21  ;;  %v1090_v33 = vpop.f32.mrf.mxu0 }
 0x1dd   :  { %v1236_v43 = vpop.f32.mrf.mxu1 }
 0x1de   :  { %v1087_v47 = vadd.f32 %v1086_v52, %v927_v56 }
 0x1e0   :  { %v1233_v37 = vadd.f32 %v1232_v27, %v1087_v47 }
 0x1e1   :  { %v727_v36 = vpop.f32.mrf.mxu2  ;;  %v932_v31 = vpop.f32.mrf.mxu3 }
 0x1e2   :  { %1284 = vst [vmem:[#allocation2 + $0xc8] sm:$0xff] %v1233_v37  ;;  %v1316_v51 = vmax.f32 %v1233_v37, 0.0  ;;  %v728_v17 = vadd.f32 %v727_v36, %v2553_v25 }
 0x1e4   :  { %v1486_v53 = vpack.c.bf16 %v1316_v51, %v1315_v2  ;;  %v933_v11 = vadd.f32 %v932_v31, %v728_v17  ;;  %v1094_v44 = vpop.f32.mrf.mxu0 }
 0x1e5   :  { %v1240_v38 = vpop.f32.mrf.mxu1 }
 0x1e6   :  { %1514 = vst [vmem:[#allocation4 + $0x60] sm:$0xff] %v1486_v53   ;;  %v1091_v4 = vadd.f32 %v1090_v33, %v933_v11 }
 0x1e8   :  { %v1237_v7 = vadd.f32 %v1236_v43, %v1091_v4 }
 0x1e9   :  { %v732_v46 = vpop.f32.mrf.mxu2  ;;  %v938_v24 = vpop.f32.mrf.mxu3 }
 0x1ea   :  { %1285 = vst [vmem:[#allocation2 + $0xd0] sm:$0xff] %v1237_v7  ;;  %v733_v41 = vadd.f32 %v732_v46, %v2554_v6  ;;  %v1317_v5 = vmax.f32 %v1237_v7, 0.0 }
 0x1ec   :  { %v939_v28 = vadd.f32 %v938_v24, %v733_v41  ;;  %v1098_v48 = vpop.f32.mrf.mxu0 }
 0x1ed   :  { %v1244_v9 = vpop.f32.mrf.mxu1 }
 0x1ee   :  { %v1095_v49 = vadd.f32 %v1094_v44, %v939_v28 }
 0x1f0   :  { %v1241_v30 = vadd.f32 %v1240_v38, %v1095_v49 }
 0x1f1   :  { %v737_v23 = vpop.f32.mrf.mxu2  ;;  %v944_v10 = vpop.f32.mrf.mxu3 }
 0x1f2   :  { %1286 = vst [vmem:[#allocation2 + $0xd8] sm:$0xff] %v1241_v30  ;;  %v1318_v32 = vmax.f32 %v1241_v30, 0.0  ;;  %v738_v14 = vadd.f32 %v737_v23, %v2555_v50 }
 0x1f4   :  { %v1491_v13 = vpack.c.bf16 %v1318_v32, %v1317_v5  ;;  %v945_v0 = vadd.f32 %v944_v10, %v738_v14  ;;  %v1102_v61 = vpop.f32.mrf.mxu0 }
 0x1f5   :  { %v1248_v54 = vpop.f32.mrf.mxu1 }
 0x1f6   :  { %1515 = vst [vmem:[#allocation4 + $0x68] sm:$0xff] %v1491_v13   ;;  %v1099_v15 = vadd.f32 %v1098_v48, %v945_v0 }
 0x1f8   :  { %v1245_v3 = vadd.f32 %v1244_v9, %v1099_v15 }
 0x1f9   :  { %v742_v63 = vpop.f32.mrf.mxu2  ;;  %v950_v34 = vpop.f32.mrf.mxu3 }
 0x1fa   :  { %1287 = vst [vmem:[#allocation2 + $0xe0] sm:$0xff] %v1245_v3  ;;  %v743_v20 = vadd.f32 %v742_v63, %v2556_v22  ;;  %v1319_v39 = vmax.f32 %v1245_v3, 0.0 }
 0x1fc   :  { %v951_v60 = vadd.f32 %v950_v34, %v743_v20  ;;  %v1106_v57 = vpop.f32.mrf.mxu0 }
 0x1fd   :  { %v1252_v26 = vpop.f32.mrf.mxu1 }
 0x1fe   :  { %v1103_v16 = vadd.f32 %v1102_v61, %v951_v60 }
 0x200   :  { %v1249_v35 = vadd.f32 %v1248_v54, %v1103_v16 }
 0x201   :  { %v747_v62 = vpop.f32.mrf.mxu2  ;;  %v956_v42 = vpop.f32.mrf.mxu3 }
 0x202   :  { %1288 = vst [vmem:[#allocation2 + $0xe8] sm:$0xff] %v1249_v35  ;;  %v1320_v18 = vmax.f32 %v1249_v35, 0.0  ;;  %v748_v40 = vadd.f32 %v747_v62, %v2557_v59 }
 0x204   :  { %v1496_v19 = vpack.c.bf16 %v1320_v18, %v1319_v39  ;;  %v957_v29 = vadd.f32 %v956_v42, %v748_v40  ;;  %v1110_v8 = vpop.f32.mrf.mxu0 }
 0x205   :  { %v1256_v21 = vpop.f32.mrf.mxu1 }
 0x206   :  { %1516 = vst [vmem:[#allocation4 + $0x70] sm:$0xff] %v1496_v19   ;;  %v1107_v55 = vadd.f32 %v1106_v57, %v957_v29 }
 0x208   :  { %v1253_v52 = vadd.f32 %v1252_v26, %v1107_v55 }
 0x209   :  { %v752_v27 = vpop.f32.mrf.mxu2  ;;  %v962_v45 = vpop.f32.mrf.mxu3 }
 0x20a   :  { %1289 = vst [vmem:[#allocation2 + $0xf0] sm:$0xff] %v1253_v52  ;;  %v753_v58 = vadd.f32 %v752_v27, %v2558_v12  ;;  %v1321_v43 = vmax.f32 %v1253_v52, 0.0 }
 0x20c   :  { %v963_v1 = vadd.f32 %v962_v45, %v753_v58 }
 0x20e   :  { %v1111_v56 = vadd.f32 %v1110_v8, %v963_v1 }
 0x210   :  { %v1257_v33 = vadd.f32 %v1256_v21, %v1111_v56 }
 0x212   :  { %1290 = vst [vmem:[#allocation2 + $0xf8] sm:$0xff] %v1257_v33  ;;  %v1322_v47 = vmax.f32 %v1257_v33, 0.0 }
 0x213   :  { %1399 = dma.vmem_to_hbm [thread:$0]  %s1392_s27, 4096, %s1394_s30, [#allocation3], %s1581_s10, %s1581_s10, %s1582_s11  }
 0x214   :  { %v1501_v37 = vpack.c.bf16 %v1322_v47, %v1321_v43 }
 0x216   :  { %1517 = vst [vmem:[#allocation4 + $0x78] sm:$0xff] %v1501_v37  }
 0x217   :  { %1412 = dma.vmem_to_hbm [thread:$0]  %s1405_s6, 2048, %s1407_s9, [#allocation5], %s1583_s3, %s1583_s3, %s1584_s12  }
 0x218   :  { %1575 = dma.done.wait [#allocation3], 4096  }
 0x219   :  { %1576 = vsyncadd [#allocation3], 4294963200 }
 0x21a   :  { %1577 = dma.done.wait [#allocation5], 2048  }
 0x21b   :  { %1578 = vsyncadd [#allocation5], 4294965248 }
 0x21c   :  { %1421 = vsyncpa [#allocation3], 1 }
 0x21d   :  { %1422 = vsyncpa [#allocation5], 1 }

</bundles_post_ra>
